<compile_context>
chip_gen: v6e
topology: v6e:2x2x1
jax: 0.10.0
libtpu: 0.0.40
codegen_flags: <defaults>
</compile_context>

<pallas_src>
import jax
import jax.numpy as jnp
from jax import lax
from jax.experimental import pallas as pl
from jax.experimental.pallas import tpu as pltpu

C_IN = 256              # RefNet hard-codes VotingModule(vote_factor, 256)
N_SEED = 128            # number of seed points (small test size)
XYZ_PAD = 128           # conv3 xyz head padded to a full lane group
OUT_W = XYZ_PAD + C_IN  # fused output slab width: [xyz_off(128) | feat(256)]
TILE_M = 512            # default rows per grid step (clamped below)
BN_EPS = 1e-5
NORM_EPS = 1e-12


# ----------------------------------------------------------------------------
# Pallas kernel: VotingModule (1x1-conv MLP) + vote residual + L2 normalize
# ----------------------------------------------------------------------------
def _vote_kernel(feat_ref, w1_ref, w2_ref, w3_ref, b_ref, out_ref):
    # feat tile: (tile_m, C_IN) f32 — rows are flattened (batch*seed) points.
    f32 = feat_ref[...]
    f_bf = f32.astype(jnp.bfloat16)            # bf16 feeds the MXU only

    # packed biases: [b1(256) | b2(256) | b3_fused(128 + 256)]   (f32)
    b1 = b_ref[:, 0:C_IN]
    b2 = b_ref[:, C_IN:2 * C_IN]
    b3 = b_ref[:, 2 * C_IN:]

    # conv1 (1x1, BN folded) + ReLU — bf16 MXU matmul, f32 accumulate.
    h = jnp.dot(f_bf, w1_ref[...], preferred_element_type=jnp.float32) + b1
    h = jnp.maximum(h, 0.0)
    # conv2 (1x1, BN folded) + ReLU
    h = jnp.dot(h.astype(jnp.bfloat16), w2_ref[...],
                preferred_element_type=jnp.float32) + b2
    h = jnp.maximum(h, 0.0)
    # conv3 fused head: lanes [0:128] xyz offset (3 real + 125 zero columns),
    # lanes [128:384] feature residual.  The 256x384 contraction maps natively
    # onto the MXU; no split into two dots.
    h3 = jnp.dot(h.astype(jnp.bfloat16), w3_ref[...],
                 preferred_element_type=jnp.float32) + b3
    off = h3[:, :XYZ_PAD]                      # (tile_m, 128), lane-dense
    res = h3[:, XYZ_PAD:]                      # (tile_m, 256)

    # vote_features = seed_features + residual (full-precision seeds, matches
    # torch), then channel-wise L2 normalization via rsqrt (EUP) + tiny eps.
    vf = f32 + res
    inv = lax.rsqrt(jnp.sum(vf * vf, axis=-1, keepdims=True) + NORM_EPS)

    # Single fused, lane-aligned output slab (one output DMA stream per step).
    out_ref[:, :XYZ_PAD] = off.astype(out_ref.dtype)
    out_ref[:, XYZ_PAD:] = (vf * inv).astype(out_ref.dtype)


def _choose_tile_m(m_rows, tile_m):
    """Round the tile to a multiple of 128 and clamp so the grid keeps >= 2
    steps (both v7x TensorCores get work); minimum tile is 128 rows."""
    tile_m = max(128, (int(tile_m) // 128) * 128)
    half = max(128, (m_rows // 2 // 128) * 128)
    return min(tile_m, half)


def vote_and_normalize(seed_xyz, seed_features_nlc, packed_params,
                       tile_m=TILE_M, out_dtype=jnp.bfloat16):
    """seed_xyz: (B, N, 3) f32; seed_features_nlc: (B, N, C_IN) f32.

    Returns (vote_xyz (B, N, 3) f32, vote_features_nlc (B, N, C_IN) out_dtype)
    with vote features L2-normalized over channels.
    """
    B, N, _ = seed_xyz.shape
    assert seed_features_nlc.shape == (B, N, C_IN)
    M = B * N
    tile_m = _choose_tile_m(M, tile_m)
    M_pad = pl.cdiv(M, tile_m) * tile_m

    # Fold batch into rows.  Feature input stays f32 (exact residual add);
    # pad only when needed (skipped in the common M % tile == 0 case).
    feat_flat = seed_features_nlc.reshape(M, C_IN).astype(jnp.float32)
    if M_pad != M:
        feat_flat = jnp.pad(feat_flat, ((0, M_pad - M), (0, 0)))

    w1, w2, w3, b_all = packed_params

    # Constant index_maps -> Pallas keeps weights/biases resident in VMEM.
    resident = lambda shape: pl.BlockSpec(shape, lambda i: (0,) * len(shape))

    grid_spec = pltpu.PrefetchScalarGridSpec(
        num_scalar_prefetch=0,
        grid=(M_pad // tile_m,),
        in_specs=[
            pl.BlockSpec((tile_m, C_IN), lambda i: (i, 0)),   # seed features f32
            resident((C_IN, C_IN)),                           # w1 (bf16)
            resident((C_IN, C_IN)),                           # w2 (bf16)
            resident((C_IN, OUT_W)),                          # w3 fused (bf16)
            resident((1, 2 * C_IN + OUT_W)),                  # packed biases f32
        ],
        out_specs=pl.BlockSpec((tile_m, OUT_W), lambda i: (i, 0)),
    )

    out = pl.pallas_call(
        _vote_kernel,
        grid_spec=grid_spec,
        out_shape=jax.ShapeDtypeStruct((M_pad, OUT_W), out_dtype),
        compiler_params=pltpu.CompilerParams(
            dimension_semantics=("parallel",)),
    )(feat_flat, w1, w2, w3, b_all)

    # xyz residual add on the tiny (M, 3) slice stays in the wrapper — no
    # padded xyz input DMA into the kernel.
    off = out[:M, :3].astype(jnp.float32)
    vote_xyz = (seed_xyz.reshape(M, 3) + off).reshape(B, N, 3)
    vote_feat = out[:M, XYZ_PAD:].reshape(B, N, C_IN)
    return vote_xyz, vote_feat


# ----------------------------------------------------------------------------
# Deterministic parameter init (synthetic — no checkpoint load) + packing
# ----------------------------------------------------------------------------
def init_voting_params(key):
    ks = jax.random.split(key, 6)
    scale = 0.02
    w1 = scale * jax.random.normal(ks[0], (C_IN, C_IN), jnp.float32)
    b1 = scale * jax.random.normal(ks[1], (1, C_IN), jnp.float32)
    w2 = scale * jax.random.normal(ks[2], (C_IN, C_IN), jnp.float32)
    b2 = scale * jax.random.normal(ks[3], (1, C_IN), jnp.float32)
    # conv3 outputs (3 + C_IN) channels: [xyz offset | feature residual].
    w3 = scale * jax.random.normal(ks[4], (C_IN, 3 + C_IN), jnp.float32)
    b3 = scale * jax.random.normal(ks[5], (1, 3 + C_IN), jnp.float32)
    # Fold eval-mode BatchNorm with default running stats (mean=0, var=1,
    # gamma=1, beta=0) into conv1/conv2: y = conv(x) / sqrt(1 + eps).
    # TODO(synk): real checkpoints must fold the actual running stats here.
    bn = 1.0 / jnp.sqrt(1.0 + BN_EPS)
    return (w1 * bn, b1 * bn, w2 * bn, b2 * bn, w3, b3)


def pack_voting_params(raw):
    """Fuse conv3 heads (xyz head padded to 128 lanes), cast weights to bf16,
    and concatenate all biases into one lane-aligned f32 operand."""
    w1, b1, w2, b2, w3, b3 = raw
    w3x_pad = jnp.pad(w3[:, :3], ((0, 0), (0, XYZ_PAD - 3)))
    w3_fused = jnp.concatenate([w3x_pad, w3[:, 3:]], axis=1)     # (C_IN, 384)
    b3x_pad = jnp.pad(b3[:, :3], ((0, 0), (0, XYZ_PAD - 3)))
    b_all = jnp.concatenate([b1, b2, b3x_pad, b3[:, 3:]],
                            axis=1).astype(jnp.float32)          # (1, 896)
    return (w1.astype(jnp.bfloat16),
            w2.astype(jnp.bfloat16),
            w3_fused.astype(jnp.bfloat16),
            b_all)


# ----------------------------------------------------------------------------
# RefNet forward (kernel for the vgen + normalize hot path; stubs elsewhere)
# ----------------------------------------------------------------------------
def refnet_forward(data_dict, packed_params, backbone_proj):
    # TODO(synk): Pointnet2Backbone (FPS / ball-query / set-abstraction) has no
    # clean Pallas equivalent here; stand-in: take the first N_SEED points as
    # seeds and embed them with a deterministic linear projection (plain JAX).
    pc = data_dict["point_clouds"]                     # (B, N_points, 3)
    seed_xyz = pc[:, :N_SEED, :]                       # (B, N_SEED, 3)
    seed_features_nlc = jnp.tanh(seed_xyz @ backbone_proj)   # (B, N_SEED, C_IN)

    data_dict["seed_xyz"] = seed_xyz
    data_dict["seed_features"] = jnp.transpose(seed_features_nlc, (0, 2, 1))  # (B,C,N)
    data_dict["seed_inds"] = jnp.broadcast_to(
        jnp.arange(N_SEED, dtype=jnp.int32), (pc.shape[0], N_SEED))

    # ---- Pallas kernel: VotingModule + L2 feature normalization ----
    vote_xyz, vote_feat_nlc = vote_and_normalize(
        seed_xyz, seed_features_nlc, packed_params)
    data_dict["vote_xyz"] = vote_xyz                                    # (B,N,3) f32
    data_dict["vote_features"] = jnp.transpose(vote_feat_nlc, (0, 2, 1))  # (B,C,N) bf16

    # TODO(synk): ProposalModule (vote-FPS sampling + box heads) not defined in
    # the reference source; omitted.
    # TODO(synk): GruLayer (language GRU) and EvaluateModule (matching) not
    # defined in the reference source; omitted.
    return data_dict


if __name__ == "__main__":
    key = jax.random.PRNGKey(0)
    k_pc, k_lang, k_params, k_proj = jax.random.split(key, 4)

    B, N_POINTS = 2, 1024
    data_dict = {
        "point_clouds": jax.random.normal(k_pc, (B, N_POINTS, 3), jnp.float32),
        "lang_feat": jax.random.normal(k_lang, (B, 8, 300), jnp.float32),
    }
    params = pack_voting_params(init_voting_params(k_params))
    backbone_proj = 0.1 * jax.random.normal(k_proj, (3, C_IN), jnp.float32)

    out = refnet_forward(data_dict, params, backbone_proj)
    jax.block_until_ready(out["vote_features"])
    jax.block_until_ready(out["vote_xyz"])

    # sanity: vote features are unit-norm along the channel axis (dim=1);
    # tolerance sized for the bf16 output cast.
    norms = jnp.linalg.norm(out["vote_features"].astype(jnp.float32), axis=1)
    assert out["vote_xyz"].shape == (B, N_SEED, 3)
    assert out["vote_features"].shape == (B, C_IN, N_SEED)
    assert bool(jnp.all(jnp.abs(norms - 1.0) < 1e-2))

    print("KERNEL_OK")
</pallas_src>

<mosaic_0001>
module attributes {stable_mosaic.version = 11 : i64} {
  func.func @_vote_kernel(%arg0: i32, %arg1: memref<128x256xf32, #tpu.memory_space<vmem>>, %arg2: memref<256x256xbf16, #tpu.memory_space<vmem>>, %arg3: memref<256x256xbf16, #tpu.memory_space<vmem>>, %arg4: memref<256x384xbf16, #tpu.memory_space<vmem>>, %arg5: memref<1x896xf32, #tpu.memory_space<vmem>>, %arg6: memref<128x384xbf16, #tpu.memory_space<vmem>>) attributes {dimension_semantics = [#tpu.dimension_semantics<parallel>], iteration_bounds = array<i64: 2>, scalar_prefetch = 0 : i64, scratch_operands = 0 : i64, tpu.core_type = #tpu.core_type<tc>, window_params = [{transform_indices = @transform_0, window_bounds = array<i64: 128, 256>}, {pipeline_mode = #tpu.pipeline_mode<synchronous>, transform_indices = @transform_1, window_bounds = array<i64: 256, 256>}, {pipeline_mode = #tpu.pipeline_mode<synchronous>, transform_indices = @transform_2, window_bounds = array<i64: 256, 256>}, {pipeline_mode = #tpu.pipeline_mode<synchronous>, transform_indices = @transform_3, window_bounds = array<i64: 256, 384>}, {pipeline_mode = #tpu.pipeline_mode<synchronous>, transform_indices = @transform_4, window_bounds = array<i64: 1, 896>}, {transform_indices = @transform_5, window_bounds = array<i64: 128, 384>}]} {
    %c0 = arith.constant 0 : index
    %c0_0 = arith.constant 0 : index
    %0 = vector.load %arg1[%c0, %c0_0] : memref<128x256xf32, #tpu.memory_space<vmem>>, vector<128x256xf32>
    %1 = arith.truncf %0 : vector<128x256xf32> to vector<128x256xbf16>
    %c0_1 = arith.constant 0 : index
    %c0_2 = arith.constant 0 : index
    %2 = vector.load %arg5[%c0_1, %c0_2] : memref<1x896xf32, #tpu.memory_space<vmem>>, vector<1x256xf32>
    %c0_3 = arith.constant 0 : index
    %c256 = arith.constant 256 : index
    %3 = vector.load %arg5[%c0_3, %c256] : memref<1x896xf32, #tpu.memory_space<vmem>>, vector<1x256xf32>
    %c0_4 = arith.constant 0 : index
    %c512 = arith.constant 512 : index
    %4 = vector.load %arg5[%c0_4, %c512] : memref<1x896xf32, #tpu.memory_space<vmem>>, vector<1x384xf32>
    %c0_5 = arith.constant 0 : index
    %c0_6 = arith.constant 0 : index
    %5 = vector.load %arg2[%c0_5, %c0_6] : memref<256x256xbf16, #tpu.memory_space<vmem>>, vector<256x256xbf16>
    %cst = arith.constant dense<0.000000e+00> : vector<128x256xf32>
    %6 = tpu.matmul %1, %5, %cst {dimension_numbers = #tpu.dot_dimension_numbers<[1], [0], [0], [1], [0, 0, 1, 1], [], []>} : vector<128x256xbf16>, vector<256x256xbf16>, vector<128x256xf32> -> vector<128x256xf32>
    %7 = vector.broadcast %2 : vector<1x256xf32> to vector<128x256xf32>
    %8 = arith.addf %6, %7 : vector<128x256xf32>
    %cst_7 = arith.constant 0.000000e+00 : f32
    %9 = vector.broadcast %cst_7 : f32 to vector<128x256xf32>
    %10 = arith.maximumf %8, %9 : vector<128x256xf32>
    %11 = arith.truncf %10 : vector<128x256xf32> to vector<128x256xbf16>
    %c0_8 = arith.constant 0 : index
    %c0_9 = arith.constant 0 : index
    %12 = vector.load %arg3[%c0_8, %c0_9] : memref<256x256xbf16, #tpu.memory_space<vmem>>, vector<256x256xbf16>
    %cst_10 = arith.constant dense<0.000000e+00> : vector<128x256xf32>
    %13 = tpu.matmul %11, %12, %cst_10 {dimension_numbers = #tpu.dot_dimension_numbers<[1], [0], [0], [1], [0, 0, 1, 1], [], []>} : vector<128x256xbf16>, vector<256x256xbf16>, vector<128x256xf32> -> vector<128x256xf32>
    %14 = vector.broadcast %3 : vector<1x256xf32> to vector<128x256xf32>
    %15 = arith.addf %13, %14 : vector<128x256xf32>
    %cst_11 = arith.constant 0.000000e+00 : f32
    %16 = vector.broadcast %cst_11 : f32 to vector<128x256xf32>
    %17 = arith.maximumf %15, %16 : vector<128x256xf32>
    %18 = arith.truncf %17 : vector<128x256xf32> to vector<128x256xbf16>
    %c0_12 = arith.constant 0 : index
    %c0_13 = arith.constant 0 : index
    %19 = vector.load %arg4[%c0_12, %c0_13] : memref<256x384xbf16, #tpu.memory_space<vmem>>, vector<256x384xbf16>
    %cst_14 = arith.constant dense<0.000000e+00> : vector<128x384xf32>
    %20 = tpu.matmul %18, %19, %cst_14 {dimension_numbers = #tpu.dot_dimension_numbers<[1], [0], [0], [1], [0, 0, 1, 1], [], []>} : vector<128x256xbf16>, vector<256x384xbf16>, vector<128x384xf32> -> vector<128x384xf32>
    %21 = vector.broadcast %4 : vector<1x384xf32> to vector<128x384xf32>
    %22 = arith.addf %20, %21 : vector<128x384xf32>
    %23 = vector.extract_strided_slice %22 {offsets = [0, 0], sizes = [128, 128], strides = [1, 1]} : vector<128x384xf32> to vector<128x128xf32>
    %24 = vector.extract_strided_slice %22 {offsets = [0, 128], sizes = [128, 256], strides = [1, 1]} : vector<128x384xf32> to vector<128x256xf32>
    %25 = arith.addf %0, %24 : vector<128x256xf32>
    %26 = arith.mulf %25, %25 : vector<128x256xf32>
    %cst_15 = arith.constant dense<0.000000e+00> : vector<128xf32>
    %27 = vector.multi_reduction <add>, %26, %cst_15 [1] : vector<128x256xf32> to vector<128xf32>
    %28 = vector.shape_cast %27 : vector<128xf32> to vector<128x1xf32>
    %cst_16 = arith.constant 9.99999996E-13 : f32
    %29 = vector.broadcast %cst_16 : f32 to vector<128x1xf32>
    %30 = arith.addf %28, %29 : vector<128x1xf32>
    %31 = math.rsqrt %30 : vector<128x1xf32>
    %32 = arith.truncf %23 : vector<128x128xf32> to vector<128x128xbf16>
    %c0_17 = arith.constant 0 : index
    %c0_18 = arith.constant 0 : index
    %33 = vector.load %arg6[%c0_17, %c0_18] : memref<128x384xbf16, #tpu.memory_space<vmem>>, vector<128x128xbf16>
    tpu.vector_store %arg6[%c0_17, %c0_18], %32 {strides = array<i32>} : memref<128x384xbf16, #tpu.memory_space<vmem>>, vector<128x128xbf16>,
    %34 = vector.broadcast %31 : vector<128x1xf32> to vector<128x256xf32>
    %35 = arith.mulf %25, %34 : vector<128x256xf32>
    %36 = arith.truncf %35 : vector<128x256xf32> to vector<128x256xbf16>
    %c0_19 = arith.constant 0 : index
    %c128 = arith.constant 128 : index
    %37 = vector.load %arg6[%c0_19, %c128] : memref<128x384xbf16, #tpu.memory_space<vmem>>, vector<128x256xbf16>
    tpu.vector_store %arg6[%c0_19, %c128], %36 {strides = array<i32>} : memref<128x384xbf16, #tpu.memory_space<vmem>>, vector<128x256xbf16>,
    return
  }
  func.func @transform_0(%arg0: i32) -> (i32, i32) {
    %c0_i32 = arith.constant 0 : i32
    %c0_i32_0 = arith.constant 0 : i32
    return %arg0, %c0_i32 : i32, i32
  }
  func.func @transform_1(%arg0: i32) -> (i32, i32) {
    %c0_i32 = arith.constant 0 : i32
    %c0_i32_0 = arith.constant 0 : i32
    %c0_i32_1 = arith.constant 0 : i32
    return %c0_i32, %c0_i32_0 : i32, i32
  }
  func.func @transform_2(%arg0: i32) -> (i32, i32) {
    %c0_i32 = arith.constant 0 : i32
    %c0_i32_0 = arith.constant 0 : i32
    %c0_i32_1 = arith.constant 0 : i32
    return %c0_i32, %c0_i32_0 : i32, i32
  }
  func.func @transform_3(%arg0: i32) -> (i32, i32) {
    %c0_i32 = arith.constant 0 : i32
    %c0_i32_0 = arith.constant 0 : i32
    %c0_i32_1 = arith.constant 0 : i32
    return %c0_i32, %c0_i32_0 : i32, i32
  }
  func.func @transform_4(%arg0: i32) -> (i32, i32) {
    %c0_i32 = arith.constant 0 : i32
    %c0_i32_0 = arith.constant 0 : i32
    %c0_i32_1 = arith.constant 0 : i32
    return %c0_i32, %c0_i32_0 : i32, i32
  }
  func.func @transform_5(%arg0: i32) -> (i32, i32) {
    %c0_i32 = arith.constant 0 : i32
    %c0_i32_0 = arith.constant 0 : i32
    return %arg0, %c0_i32 : i32, i32
  }
}

</mosaic_0001>

<bundles_post_ra>
// kernel: tpu_custom_call.1
= control target key start
LH: loop header
LB: loop body
LE: loop exit
PB: predicated region body
PF: predicated region fallthrough
CT: control target
= control target key end

     0   :  { %10 = vsyncpa [#allocation3], 0  ;;  %s3509_s0 = inlined_call_operand.hbm [shape: f32[256,256], index: 0, kind: input, shape index: {}]   ;;  %s3510_s1 = inlined_call_operand.hbm [shape: bf16[256,256], index: 1, kind: input, shape index: {}]   ;;  %s3511_s2 = inlined_call_operand.hbm [shape: bf16[256,256], index: 2, kind: input, shape index: {}]   ;;  %s3512_s3 = inlined_call_operand.hbm [shape: bf16[256,384], index: 3, kind: input, shape index: {}]   ;;  %s3513_s4 = inlined_call_operand.vmem [shape: f32[1,896], index: 4, kind: input, shape index: {}]   ;;  %s3514_s5 = inlined_call_operand.hbm [shape: bf16[256,384], index: 5, kind: output, shape index: {}]  }
   0x1   :  { %12 = vsyncpa [#allocation3 + $0x1], 0 }
   0x2   :  { %13 = vsyncpa [#allocation6], 0 }
   0x3   :  { %14 = vsyncpa [#allocation9], 0 }
   0x4   :  { %15 = vsyncpa [#allocation4], 0 }
   0x5   :  { %17 = vsyncpa [#allocation4 + $0x1], 0  ;;  %s2897_s18 = smov 0   ;;  %s2899_s19 = smov 0  }
   0x6   :  { %s2901_s20 = smov 0   ;;  %s2903_s21 = smov 0  }
   0x7 LB: > { %s2918_s22 = sadd.s32 4294967295, %s2852_s21   ;;  %s2101_s23 = sadd.s32 4294967294, %s2852_s21   ;;  %s2852_s21 = sphi %s2903_s21, %s3538_s21   ;;  %s2848_s20 = sphi %s2901_s20, %s3537_s20   ;;  %s2844_s19 = sphi %s2899_s19, %s3536_s19   ;;  %s2840_s18 = sphi %s2897_s18, %s3535_s18  }
   0x8   : > { %p43_p0 = scmp.ne.s32.totalorder %s2844_s19, %s2840_s18  ;;  %p3515_p1 = scmp.eq.s32.totalorder %s2918_s22, 0 }
   0x9   : > { %p157_p3 = scmp.eq.s32.totalorder %s2101_s23, 1  ;;  %p2102_p5 = scmp.ge.s32.totalorder %s2852_s21, 1 }
   0xa   : > { %p2927_p4 = por %p3515_p1, %p43_p0  ;;  %p164_p7 = scmp.lt.s32.totalorder %s2852_s21, 3 }
   0xb   : > { %p2932_p6 = por %p157_p3, %p43_p0  ;;  %s2854_s27 = smov [#allocation5]  }
   0xc   : > { %s3519_s24 = scalar_select %p2927_p4, 1, 0 }
   0xd   : > { %s3520_s25 = scalar_select %p2932_p6, 1, 0 }
   0xe   : > { %p2937_p8 = pnand %p2102_p5, %p164_p7  ;;  %s176_s28 = sshll.u32 %s2854_s27, 4  ;;  %s177_s28 = int_to_ptr.vmem [resolvable:$true] %s176_s28 }
   0xf   : > { %s2855_s30 = smov [#allocation7]   ;;  %s2856_s7 = smov [#allocation8]  }
  0x10   : > { %s3521_s26 = scalar_select %p2937_p8, 1, 0 }
  0x11   : > { %p2381_p9 = pneg %p2937_p8  ;;  %s189_s6 = sshll.u32 %s2855_s30, 4  ;;  %s190_s6 = int_to_ptr.vmem [resolvable:$true] %s189_s6 }
  0x12   : > { %s202_s8 = sshll.u32 %s2856_s7, 4  ;;  %s2685_s9 = scalar_lea.vmem %s177_s28, 4096  ;;  %s203_s8 = int_to_ptr.vmem [resolvable:$true] %s202_s8 }
  0x13   : > { %p2946_p11 = pnand %p2381_p9, %p3515_p1  ;;  %p2686_p13 = scmp.ne.s32.totalorder %s177_s28, %s2685_s9 }
  0x14   : > { %p2693_p5 = scmp.lt.s32.totalorder %s177_s28, %s177_s28  ;;  %p2694_p7 = scmp.lt.s32.totalorder %s2685_s9, %s2685_s9 }
  0x15   : > { %p2676_p12 = pneg %p2946_p11 }
  0x16   : > { %p2695_p9 = por %p2694_p7, %p2693_p5 }
  0x17   : > { %p2688_p0 = pnand %p2686_p13, %p2676_p12 }
  0x19   : > { %p2689_p3 = pneg %p2688_p0 }
  0x1b   : > { %p2696_p10 = pnand %p2695_p9, %p2689_p3 }
  0x1d   : > { %2699 = shalt.err (!%p2696_p10)
}
  0x1e   : > { %s2857_s10 = smov 128   ;;  %s2858_s11 = smov 8  }
  0x1f   : > { %2384 = dma.hbm_to_vmem [thread:$0]  (!%p2946_p11), %s3510_s1, 4096, %s177_s28, [#allocation6], %s2857_s10, %s2857_s10, %s2858_s11  }
  0x20   : > { %s2711_s14 = scalar_lea.vmem %s190_s6, 4096  ;;  %p2719_p2 = scmp.lt.s32.totalorder %s190_s6, %s190_s6 }
  0x21   : > { %p2712_p1 = scmp.ne.s32.totalorder %s190_s6, %s2711_s14  ;;  %p2720_p6 = scmp.lt.s32.totalorder %s2711_s14, %s2711_s14 }
  0x23   : > { %p2714_p13 = pnand %p2712_p1, %p2676_p12  ;;  %p2721_p5 = por %p2720_p6, %p2719_p2 }
  0x25   : > { %p2715_p0 = pneg %p2714_p13 }
  0x27   : > { %p2722_p3 = pnand %p2721_p5, %p2715_p0 }
  0x29   : > { %2725 = shalt.err (!%p2722_p3)
}
  0x2a   : > { %2387 = dma.hbm_to_vmem [thread:$0]  (!%p2946_p11), %s3511_s2, 4096, %s190_s6, [#allocation6], %s2857_s10, %s2857_s10, %s2858_s11  }
  0x2b   : > { %s2737_s17 = scalar_lea.vmem %s203_s8, 6144  ;;  %p2745_p9 = scmp.lt.s32.totalorder %s203_s8, %s203_s8 }
  0x2c   : > { %p2738_p10 = scmp.ne.s32.totalorder %s203_s8, %s2737_s17  ;;  %p2746_p13 = scmp.lt.s32.totalorder %s2737_s17, %s2737_s17 }
  0x2e   : > { %p2740_p7 = pnand %p2738_p10, %p2676_p12  ;;  %p2747_p4 = por %p2746_p13, %p2745_p9 }
  0x30   : > { %p2741_p1 = pneg %p2740_p7 }
  0x32   : > { %p2748_p2 = pnand %p2747_p4, %p2741_p1 }
  0x34   : > { %2751 = shalt.err (!%p2748_p2)
}
  0x35   : > { %s2859_s23 = smov 192   ;;  %s2860_s27 = smov 12  }
  0x36   : > { %2390 = dma.hbm_to_vmem [thread:$0]  (!%p2946_p11), %s3512_s3, 6144, %s203_s8, [#allocation9], %s2859_s23, %s2859_s23, %s2860_s27  }
  0x37   : > { %s2977_s6 = sadd.s32 1, %s2852_s21   ;;  %s30_s9 = sadd.s32 1, %s2848_s20 }
  0x38   : > { %s27_s7 = ssub.s32 %s2852_s21, %s2977_s6  ;;  %p37_p6 = scmp.ne.s32.totalorder %s2848_s20, %s2844_s19 }
  0x39   : > { %p28_p4 = scmp.eq.s32.totalorder %s27_s7, 0  ;;  %p38_p12 = scmp.eq.s32.totalorder %s2852_s21, 0 }
  0x3a   : > { %p2402_p0 = scmp.lt.s32.totalorder %s2852_s21, 2  ;;  %p3523_p3 = scmp.eq.s32.totalorder %s2918_s22, 1 }
  0x3b   : > { %s2987_s10 = scalar_select %p28_p4, %s2848_s20, %s30_s9  }
  0x3c   : > { %p39_p5 = por %p38_p12, %p37_p6  ;;  %p2991_p10 = por %p3523_p3, %p37_p6 }
  0x3d   : > { %s219_s29 = sand.u32 1, %s2848_s20   ;;  %s2266_s12 = sshll.u32 %s2852_s21, 12 }
  0x3e   : > { %s3524_s11 = scalar_select %p2991_p10, 1, 0 }
  0x3f   : > { %s2107_s8 = sshll.u32 %s219_s29, 8  ;;  %s3000_s15 = scalar_lea.hbm %s3509_s0, %s2266_s12 }
  0x40   : > { %s223_s16 = scalar_lea.vmem [#allocation2], %s2107_s8  ;;  %p3002_p11 = pnand %p2402_p0, %p39_p5 }
  0x41   : > { %s231_s17 = sshll.u32 %s223_s16, 4  ;;  %s3008_s27 = scalar_lea.sflag [#allocation3], %s219_s29  ;;  %s3006_s17 = int_to_ptr.vmem [resolvable:$true] %s231_s17 }
  0x42   : > { %s2752_s28 = scalar_lea.hbm %s3000_s15, 4096  ;;  %p2754_p1 = pneg %p3002_p11 }
  0x43   : > { %p2753_p7 = scmp.ne.s32.totalorder %s3000_s15, %s2752_s28  ;;  %s2757_s9 = scalar_lea.hbm %s3509_s0, 8192 }
  0x44   : > { %p2758_p2 = scmp.lt.s32.totalorder %s3000_s15, %s3509_s0  ;;  %p2759_p4 = scmp.lt.s32.totalorder %s2757_s9, %s2752_s28 }
  0x45   : > { %p2755_p9 = pnand %p2754_p1, %p2753_p7 }
  0x46   : > { %p2760_p6 = por %p2759_p4, %p2758_p2 }
  0x47   : > { %p2756_p13 = pneg %p2755_p9 }
  0x49   : > { %p2761_p12 = pnand %p2760_p6, %p2756_p13 }
  0x4b   : > { %2764 = shalt.err (!%p2761_p12)
}
  0x4c   : > { %s2765_s29 = scalar_lea.vmem %s3006_s17, 4096  ;;  %s2861_s13 = smov [#allocation2]  }
  0x4d   : > { %p2766_p0 = scmp.ne.s32.totalorder %s3006_s17, %s2765_s29  ;;  %s2770_s14 = sshll.u32 %s2861_s13, 4  ;;  %s2771_s14 = int_to_ptr.vmem [resolvable:$false] %s2770_s14 }
  0x4e   : > { %s2772_s16 = scalar_lea.vmem %s2771_s14, 8192  ;;  %p2773_p7 = scmp.lt.s32.totalorder %s3006_s17, %s2771_s14 }
  0x4f   : > { %p2768_p5 = pnand %p2766_p0, %p2754_p1  ;;  %p2774_p9 = scmp.lt.s32.totalorder %s2772_s16, %s2765_s29 }
  0x51   : > { %p2769_p3 = pneg %p2768_p5  ;;  %p2775_p10 = por %p2774_p9, %p2773_p7 }
  0x53   : > { %p2776_p8 = pnand %p2775_p10, %p2769_p3 }
  0x55   : > { %2779 = shalt.err (!%p2776_p8)
}
  0x56   : > { %s2862_s28 = smov 256   ;;  %s2863_s30 = smov 16  }
  0x57   : > { %2394 = dma.hbm_to_vmem [thread:$0]  (!%p3002_p11), %s3000_s15, 4096, %s3006_s17, %s3008_s27, %s2862_s28, %s2862_s28, %s2863_s30  }
  0x58   : > { %p3526_p1 = scmp.ne.s32.totalorder %s3521_s26, 0 }
  0x59   : > { %s3032_s7 = sand.u32 (!%p3526_p1), 1, %s2844_s19   ;;  %p3527_p8 = scmp.ne.s32.totalorder (!%p3526_p1), %s3519_s24, 0 }
  0x5a   : > { %243 = sbr.rel (%p3526_p1) target bundleno = 1016 (0x3f8), region = 40  ;;  %s2112_s9 = sshll.u32 (!%p3526_p1), %s3032_s7, 8 }
  0x5b   : > { %s246_s12 = scalar_lea.sflag (!%p3526_p1), [#allocation3], %s3032_s7  ;;  %s3036_s8 = scalar_lea.vmem (!%p3526_p1), [#allocation2], %s2112_s9 }
  0x5f   : > { %2823 = dma.done.wait (%p3527_p8), %s246_s12, 4096  }
  0x60   : > { %2825 = vsyncadd (%p3527_p8), %s246_s12, 4294963200  ;;  %p3528_p10 = scmp.eq.s32.totalorder %s2918_s22, 0 }
  0x62   : > { %2827 = dma.done.wait (%p3528_p10), [#allocation6], 8192   ;;  %p3529_p11 = pmov %p3528_p10 }
  0x63   : > { %p3530_p13 = pmov %p3528_p10 }
  0x64   : > { %2829 = vsyncadd (%p3529_p11), [#allocation6], 4294959104 }
  0x65   : > { %2831 = dma.done.wait (%p3530_p13), [#allocation9], 6144   ;;  %p3531_p2 = pmov %p3528_p10 }
  0x66   : > { %v2450_v0 = vld [vmem:[#allocation5 + $0x74] ss:$8 sps:$4 sm:$0xff]   ;;  %v2452_v1 = vld [vmem:[#allocation5 + $0x70] ss:$8 sps:$4 sm:$0xff]   ;;  %v2453_v2 = vld [vmem:[#allocation5 + $0x64] ss:$8 sps:$4 sm:$0xff]  }
  0x67   : > { %2833 = vsyncadd (%p3531_p2), [#allocation9], 4294961152  ;;  %545 = vmatprep.subr.bf16.mxu0 %v2450_v0  ;;  %v2455_v3 = vld [vmem:[#allocation5 + $0x60] ss:$8 sps:$4 sm:$0xff]   ;;  %v2456_v4 = vld [vmem:[#allocation5 + $0x54] ss:$8 sps:$4 sm:$0xff]  }
  0x68   : > { %546 = vmatpush1.bf16.msra.mxu0 %v2452_v1  ;;  %v2458_v5 = vld [vmem:[#allocation5 + $0x50] ss:$8 sps:$4 sm:$0xff]   ;;  %v2459_v6 = vld [vmem:[#allocation5 + $0x44] ss:$8 sps:$4 sm:$0xff]   ;;  %v2461_v7 = vld [vmem:[#allocation5 + $0x40] ss:$8 sps:$4 sm:$0xff]  }
  0x69   : > { %547 = vmatprep.subr.bf16.mxu0 %v2453_v2  ;;  %v2462_v8 = vld [vmem:[#allocation5 + $0x34] ss:$8 sps:$4 sm:$0xff]   ;;  %v2464_v9 = vld [vmem:[#allocation5 + $0x30] ss:$8 sps:$4 sm:$0xff]   ;;  %v2465_v10 = vld [vmem:[#allocation5 + $0x24] ss:$8 sps:$4 sm:$0xff]  }
  0x6a   : > { %v2467_v11 = vld [vmem:[#allocation5 + $0x20] ss:$8 sps:$4 sm:$0xff]   ;;  %v2468_v12 = vld [vmem:[#allocation5 + $0x14] ss:$8 sps:$4 sm:$0xff]   ;;  %v2470_v16 = vld [vmem:[#allocation5 + $0x10] ss:$8 sps:$4 sm:$0xff]  }
  0x6b   : > { %v292_v13 = vld [vmem:[%s3036_s8 + $0x8] sm:$0xff]  ;;  %v294_v14 = vld [vmem:[%s3036_s8 + $0x18] sm:$0xff]  ;;  %v291_v50 = vld [vmem:[%s3036_s8] sm:$0xff]  ;;  %s2363_s29 = smul.u32 192, %s3032_s7  ;;  %p3532_p6 = scmp.ne.s32.totalorder %s3524_s11, 0 }
  0x6c   : > { %548 = vmatpush1.bf16.msra.mxu0 %v2455_v3  ;;  %v324_v15 = vpack.c.bf16 %v294_v14, %v292_v13  ;;  %v2471_v17 = vld [vmem:[#allocation5 + $0x4] ss:$8 sps:$4 sm:$0xff]   ;;  %v2473_v18 = vld [vmem:[#allocation5] ss:$8 sps:$4 sm:$0xff]   ;;  %v2474_v19 = vld [vmem:[#allocation5 + $0xf4] ss:$8 sps:$4 sm:$0xff]  }
  0x6d   : > { %549 = vmatprep.subr.bf16.mxu0 %v2456_v4  ;;  %v2476_v20 = vld [vmem:[#allocation5 + $0xf0] ss:$8 sps:$4 sm:$0xff]   ;;  %v2477_v21 = vld [vmem:[#allocation5 + $0xe4] ss:$8 sps:$4 sm:$0xff]   ;;  %v2498_v22 = vld [vmem:[#allocation7 + $0x74] ss:$8 sps:$4 sm:$0xff]  }
  0x6e   : > { %577 = vmatprep.mubr.bf16.mxu0 %v324_v15  ;;  %v2500_v23 = vld [vmem:[#allocation7 + $0x70] ss:$8 sps:$4 sm:$0xff]   ;;  %v2479_v24 = vld [vmem:[#allocation5 + $0xe0] ss:$8 sps:$4 sm:$0xff]   ;;  %909 = vmatprep.subr.bf16.mxu1 %v2498_v22  ;;  %v2501_v25 = vld [vmem:[#allocation7 + $0x64] ss:$8 sps:$4 sm:$0xff]  }
  0x6f   : > { %v2480_v26 = vld [vmem:[#allocation5 + $0xd4] ss:$8 sps:$4 sm:$0xff]   ;;  %910 = vmatpush1.bf16.msra.mxu1 %v2500_v23  ;;  %v2503_v27 = vld [vmem:[#allocation7 + $0x60] ss:$8 sps:$4 sm:$0xff]   ;;  %v2482_v29 = vld [vmem:[#allocation5 + $0xd0] ss:$8 sps:$4 sm:$0xff]  }
  0x70   : > { %550 = vmatpush1.bf16.msra.mxu0 %v2458_v5  ;;  %911 = vmatprep.subr.bf16.mxu1 %v2501_v25  ;;  %v2504_v28 = vld [vmem:[#allocation7 + $0x54] ss:$8 sps:$4 sm:$0xff]   ;;  %v2483_v30 = vld [vmem:[#allocation5 + $0xc4] ss:$8 sps:$4 sm:$0xff]   ;;  %v2506_v31 = vld [vmem:[#allocation7 + $0x50] ss:$8 sps:$4 sm:$0xff]  }
  0x71   : > { %551 = vmatprep.subr.bf16.mxu0 %v2459_v6  ;;  %v2507_v32 = vld [vmem:[#allocation7 + $0x44] ss:$8 sps:$4 sm:$0xff]   ;;  %v2485_v33 = vld [vmem:[#allocation5 + $0xc0] ss:$8 sps:$4 sm:$0xff]   ;;  %v2486_v34 = vld [vmem:[#allocation5 + $0xb4] ss:$8 sps:$4 sm:$0xff]  }
  0x72   : > { %v2509_v35 = vld [vmem:[#allocation7 + $0x40] ss:$8 sps:$4 sm:$0xff]   ;;  %v2510_v36 = vld [vmem:[#allocation7 + $0x34] ss:$8 sps:$4 sm:$0xff]   ;;  %v2488_v37 = vld [vmem:[#allocation5 + $0xb0] ss:$8 sps:$4 sm:$0xff]  }
  0x73   : > { %912 = vmatpush1.bf16.msra.mxu1 %v2503_v27  ;;  %v2489_v38 = vld [vmem:[#allocation5 + $0xa4] ss:$8 sps:$4 sm:$0xff]   ;;  %v2512_v39 = vld [vmem:[#allocation7 + $0x30] ss:$8 sps:$4 sm:$0xff]   ;;  %v2491_v41 = vld [vmem:[#allocation5 + $0xa0] ss:$8 sps:$4 sm:$0xff]  }
  0x74   : > { %552 = vmatpush1.bf16.msra.mxu0 %v2461_v7  ;;  %913 = vmatprep.subr.bf16.mxu1 %v2504_v28  ;;  %v2513_v40 = vld [vmem:[#allocation7 + $0x24] ss:$8 sps:$4 sm:$0xff]   ;;  %v2515_v42 = vld [vmem:[#allocation7 + $0x20] ss:$8 sps:$4 sm:$0xff]   ;;  %v2492_v43 = vld [vmem:[#allocation5 + $0x94] ss:$8 sps:$4 sm:$0xff]  }
  0x75   : > { %553 = vmatprep.subr.bf16.mxu0 %v2462_v8  ;;  %v2516_v44 = vld [vmem:[#allocation7 + $0x14] ss:$8 sps:$4 sm:$0xff]   ;;  %v2494_v45 = vld [vmem:[#allocation5 + $0x90] ss:$8 sps:$4 sm:$0xff]   ;;  %v2495_v47 = vld [vmem:[#allocation5 + $0x84] ss:$8 sps:$4 sm:$0xff]  }
  0x76   : > { %v2518_v46 = vld [vmem:[#allocation7 + $0x10] ss:$8 sps:$4 sm:$0xff]   ;;  %v2519_v48 = vld [vmem:[#allocation7 + $0x4] ss:$8 sps:$4 sm:$0xff]   ;;  %v2497_v49 = vld [vmem:[#allocation5 + $0x80] ss:$8 sps:$4 sm:$0xff]  }
  0x77   : > { %914 = vmatpush1.bf16.msra.mxu1 %v2506_v31  ;;  %v293_v51 = vld [vmem:[%s3036_s8 + $0x10] sm:$0xff]  ;;  %v2521_v52 = vld [vmem:[#allocation7] ss:$8 sps:$4 sm:$0xff]   ;;  %v298_v54 = vld [vmem:[%s3036_s8 + $0x38] sm:$0xff]  ;;  %s3187_s13 = scalar_lea.vmem [#allocation10], %s2363_s29  ;;  %s2364_s14 = smul.u32 3072, %s2918_s22 }
  0x78   : > { %554 = vmatpush1.bf16.msra.mxu0 %v2464_v9  ;;  %915 = vmatprep.subr.bf16.mxu1 %v2507_v32  ;;  %v296_v53 = vld [vmem:[%s3036_s8 + $0x28] sm:$0xff]  ;;  %v2522_v55 = vld [vmem:[#allocation7 + $0xf4] ss:$8 sps:$4 sm:$0xff]   ;;  %v2524_v56 = vld [vmem:[#allocation7 + $0xf0] ss:$8 sps:$4 sm:$0xff]   ;;  %v323_v57 = vpack.c.bf16 %v293_v51, %v291_v50  ;;  %s1999_s16 = sshll.u32 %s3187_s13, 4  ;;  %s3465_s16 = int_to_ptr.vmem [resolvable:$true] %s1999_s16 }
  0x79   : > { %555 = vmatprep.subr.bf16.mxu0 %v2465_v10  ;;  %v2525_v58 = vld [vmem:[#allocation7 + $0xe4] ss:$8 sps:$4 sm:$0xff]   ;;  %v326_v59 = vpack.c.bf16 %v298_v54, %v296_v53  ;;  %v297_v61 = vld [vmem:[%s3036_s8 + $0x30] sm:$0xff]  ;;  %v2527_v62 = vld [vmem:[#allocation7 + $0xe0] ss:$8 sps:$4 sm:$0xff]   ;;  %s3463_s9 = scalar_lea.hbm %s3514_s5, %s2364_s14  ;;  %s1985_s22 = scalar_lea.sflag [#allocation4], %s3032_s7 }
  0x7a   : > { %v295_v60 = vld [vmem:[%s3036_s8 + $0x20] sm:$0xff]  ;;  %v300_v63 = vld [vmem:[%s3036_s8 + $0x48] sm:$0xff]  ;;  %v302_v0 = vld [vmem:[%s3036_s8 + $0x58] sm:$0xff]  ;;  %s2780_s12 = scalar_lea.vmem %s3465_s16, 3072 }
  0x7b   : > { %916 = vmatpush1.bf16.msra.mxu1 %v2509_v35  ;;  %v2528_v1 = vld [vmem:[#allocation7 + $0xd4] ss:$8 sps:$4 sm:$0xff]   ;;  %v2530_v2 = vld [vmem:[#allocation7 + $0xd0] ss:$8 sps:$4 sm:$0xff]   ;;  %v325_v3 = vpack.c.bf16 %v297_v61, %v295_v60  ;;  %v2531_v4 = vld [vmem:[#allocation7 + $0xc4] ss:$8 sps:$4 sm:$0xff]   ;;  %v328_v5 = vpack.c.bf16 %v302_v0, %v300_v63  ;;  %p2781_p4 = scmp.ne.s32.totalorder %s3465_s16, %s2780_s12 }
  0x7c   : > { %556 = vmatpush1.bf16.msra.mxu0 %v2467_v11  ;;  %917 = vmatprep.subr.bf16.mxu1 %v2510_v36  ;;  %v299_v6 = vld [vmem:[%s3036_s8 + $0x40] sm:$0xff]  ;;  %v301_v7 = vld [vmem:[%s3036_s8 + $0x50] sm:$0xff]  ;;  %v304_v9 = vld [vmem:[%s3036_s8 + $0x68] sm:$0xff] }
  0x7d   : > { %557 = vmatprep.subr.bf16.mxu0 %v2468_v12  ;;  %v2533_v8 = vld [vmem:[#allocation7 + $0xc0] ss:$8 sps:$4 sm:$0xff]   ;;  %v306_v10 = vld [vmem:[%s3036_s8 + $0x78] sm:$0xff]  ;;  %v327_v12 = vpack.c.bf16 %v301_v7, %v299_v6  ;;  %v309_v22 = vld [vmem:[%s3036_s8 + $0x90] sm:$0xff]  ;;  %p2782_p12 = pnand %p2781_p4, %p3532_p6 }
  0x7e   : > { %v2534_v11 = vld [vmem:[#allocation7 + $0xb4] ss:$8 sps:$4 sm:$0xff]   ;;  %v330_v13 = vpack.c.bf16 %v306_v10, %v304_v9  ;;  %v2536_v14 = vld [vmem:[#allocation7 + $0xb0] ss:$8 sps:$4 sm:$0xff]   ;;  %v303_v15 = vld [vmem:[%s3036_s8 + $0x60] sm:$0xff] }
  0x7f   : > { %918 = vmatpush1.bf16.msra.mxu1 %v2512_v39  ;;  %v312_v23 = vld [vmem:[%s3036_s8 + $0xa8] sm:$0xff]  ;;  %v311_v27 = vld [vmem:[%s3036_s8 + $0xa0] sm:$0xff]  ;;  %v313_v28 = vld [vmem:[%s3036_s8 + $0xb0] sm:$0xff]  ;;  %p2783_p0 = pneg %p2782_p12 }
  0x80   : > { %558 = vmatpush1.bf16.msra.mxu0 %v2470_v16  ;;  %919 = vmatprep.subr.bf16.mxu1 %v2513_v40  ;;  %v305_v16 = vld [vmem:[%s3036_s8 + $0x70] sm:$0xff]  ;;  %v333_v31 = vpack.c.bf16 %v313_v28, %v311_v27  ;;  %v320_v35 = vld [vmem:[%s3036_s8 + $0xe8] sm:$0xff]  ;;  %v322_v36 = vld [vmem:[%s3036_s8 + $0xf8] sm:$0xff] }
  0x81   : > { %559 = vmatprep.subr.bf16.mxu0 %v2471_v17  ;;  %v308_v17 = vld [vmem:[%s3036_s8 + $0x88] sm:$0xff]  ;;  %v319_v39 = vld [vmem:[%s3036_s8 + $0xe0] sm:$0xff]  ;;  %v321_v40 = vld [vmem:[%s3036_s8 + $0xf0] sm:$0xff] }
  0x82   : > { %v2549_v50 = vld [vmem:[#allocation8 + $0xac] ss:$12 sps:$4 sm:$0xff]   ;;  %v2553_v51 = vld [vmem:[#allocation8 + $0x94] ss:$12 sps:$4 sm:$0xff]   ;;  %v2557_v53 = vld [vmem:[#allocation8 + $0x7c] ss:$12 sps:$4 sm:$0xff]  }
  0x83   : > { %920 = vmatpush1.bf16.msra.mxu1 %v2515_v42  ;;  %v2537_v42 = vld [vmem:[#allocation7 + $0xa4] ss:$8 sps:$4 sm:$0xff]   ;;  %v2567_v60 = vld [vmem:[#allocation8 + $0x30] ss:$12 sps:$4 sm:$0xff]   ;;  %v2595_v10 = vld [vmem:[#allocation8 + $0x108] ss:$12 sps:$4 sm:$0xff]  }
  0x84   : > { %560 = vmatpush1.bf16.msra.mxu0 %v2473_v18  ;;  %921 = vmatprep.subr.bf16.mxu1 %v2516_v44  ;;  %v310_v18 = vld [vmem:[%s3036_s8 + $0x98] sm:$0xff]  ;;  %v2577_v63 = vld [vmem:[#allocation8 + $0x4] ss:$12 sps:$4 sm:$0xff]   ;;  %v2575_v0 = vld [vmem:[#allocation8] ss:$12 sps:$4 sm:$0xff]  }
  0x85   : > { %561 = vmatprep.subr.bf16.mxu0 %v2474_v19  ;;  %v329_v19 = vpack.c.bf16 %v305_v16, %v303_v15  ;;  %v2540_v44 = vld [vmem:[#allocation7 + $0x94] ss:$8 sps:$4 sm:$0xff]   ;;  %v2555_v54 = vld [vmem:[#allocation8 + $0x78] ss:$12 sps:$4 sm:$0xff]   ;;  %v339_v15 = vld [vmem:[%s3513_s4] sm:$0x3] }
  0x86   : > { %v2573_v61 = vld [vmem:[#allocation8 + $0x1c] ss:$12 sps:$4 sm:$0xff]   ;;  %v2587_v6 = vld [vmem:[#allocation8 + $0x138] ss:$12 sps:$4 sm:$0xff]  }
  0x87   : > { %922 = vmatpush1.bf16.msra.mxu1 %v2518_v46  ;;  %v2543_v46 = vld [vmem:[#allocation7 + $0x84] ss:$8 sps:$4 sm:$0xff]  }
  0x88   : > { %562 = vmatpush2.bf16.msra.mxu0 %v2476_v20  ;;  %923 = vmatprep.subr.bf16.mxu1 %v2519_v48  ;;  %v332_v20 = vpack.c.bf16 %v310_v18, %v308_v17  ;;  %v2546_v48 = vld [vmem:[#allocation8 + $0x170] ss:$12 sps:$4 sm:$0xff]   ;;  %v2597_v9 = vld [vmem:[#allocation8 + $0x10c] ss:$12 sps:$4 sm:$0xff]  }
  0x89   : > { %563 = vmatprep.subr.bf16.mxu0 %v2477_v21  ;;  %v307_v21 = vld [vmem:[%s3036_s8 + $0x80] sm:$0xff] }
  0x8a   : > { %v331_v25 = vpack.c.bf16 %v309_v22, %v307_v21  ;;  %v2593_v7 = vld [vmem:[#allocation8 + $0x124] ss:$12 sps:$4 sm:$0xff]  }
  0x8b   : > { %924 = vmatpush1.bf16.msra.mxu1 %v2521_v52  ;;  %v2551_v52 = vld [vmem:[#allocation8 + $0x90] ss:$12 sps:$4 sm:$0xff]  }
  0x8c   : > { %564 = vmatpush2.bf16.msra.mxu0 %v2479_v24  ;;  %925 = vmatprep.subr.bf16.mxu1 %v2522_v55  ;;  %v314_v24 = vld [vmem:[%s3036_s8 + $0xb8] sm:$0xff]  ;;  %v2561_v55 = vld [vmem:[#allocation8 + $0x64] ss:$12 sps:$4 sm:$0xff]  }
  0x8d   : > { %565 = vmatprep.subr.bf16.mxu0 %v2480_v26  ;;  %v334_v26 = vpack.c.bf16 %v314_v24, %v312_v23 }
  0x8f   : > { %926 = vmatpush2.bf16.msra.mxu1 %v2524_v56  ;;  %v2559_v56 = vld [vmem:[#allocation8 + $0x60] ss:$12 sps:$4 sm:$0xff]  }
  0x90   : > { %566 = vmatpush2.bf16.msra.mxu0 %v2482_v29  ;;  %927 = vmatprep.subr.bf16.mxu1 %v2525_v58  ;;  %v316_v29 = vld [vmem:[%s3036_s8 + $0xc8] sm:$0xff] }
  0x91   : > { %567 = vmatprep.subr.bf16.mxu0 %v2483_v30  ;;  %v318_v30 = vld [vmem:[%s3036_s8 + $0xd8] sm:$0xff]  ;;  %v2563_v58 = vld [vmem:[#allocation8 + $0x48] ss:$12 sps:$4 sm:$0xff]  }
  0x92   : > { %v336_v32 = vpack.c.bf16 %v318_v30, %v316_v29 }
  0x93   : > { %928 = vmatpush2.bf16.msra.mxu1 %v2527_v62  ;;  %v2571_v62 = vld [vmem:[#allocation8 + $0x18] ss:$12 sps:$4 sm:$0xff]  }
  0x94   : > { %568 = vmatpush2.bf16.msra.mxu0 %v2485_v33  ;;  %929 = vmatprep.subr.bf16.mxu1 %v2528_v1  ;;  %v315_v33 = vld [vmem:[%s3036_s8 + $0xc0] sm:$0xff]  ;;  %v2581_v1 = vld [vmem:[#allocation8 + $0x16c] ss:$12 sps:$4 sm:$0xff]  }
  0x95   : > { %569 = vmatprep.subr.bf16.mxu0 %v2486_v34  ;;  %v317_v34 = vld [vmem:[%s3036_s8 + $0xd0] sm:$0xff] }
  0x97   : > { %930 = vmatpush2.bf16.msra.mxu1 %v2530_v2  ;;  %v2579_v2 = vld [vmem:[#allocation8 + $0x168] ss:$12 sps:$4 sm:$0xff]  }
  0x98   : > { %570 = vmatpush2.bf16.msra.mxu0 %v2488_v37  ;;  %931 = vmatprep.subr.bf16.mxu1 %v2531_v4  ;;  %v335_v37 = vpack.c.bf16 %v317_v34, %v315_v33  ;;  %v2583_v4 = vld [vmem:[#allocation8 + $0x150] ss:$12 sps:$4 sm:$0xff]  }
  0x99   : > { %571 = vmatprep.subr.bf16.mxu0 %v2489_v38  ;;  %v338_v38 = vpack.c.bf16 %v322_v36, %v320_v35  ;;  %v2550_v33 = vld [vmem:[#allocation8 + $0xb0] ss:$12 sps:$4 sm:$0xff]   ;;  %v2554_v36 = vld [vmem:[#allocation8 + $0x158] ss:$12 sps:$4 sm:$0xff]  }
  0x9b   : > { %932 = vmatpush2.bf16.msra.mxu1 %v2533_v8  ;;  %v2591_v8 = vld [vmem:[#allocation8 + $0x120] ss:$12 sps:$4 sm:$0xff]  }
  0x9c   : > { %572 = vmatpush2.bf16.msra.mxu0 %v2491_v41  ;;  %933 = vmatprep.subr.bf16.mxu1 %v2534_v11  ;;  %v337_v41 = vpack.c.bf16 %v321_v40, %v319_v39  ;;  %v375_v11 = vlaneseq }
  0x9d   : > { %573 = vmatprep.subr.bf16.mxu0 %v2492_v43  ;;  %v2539_v43 = vld [vmem:[#allocation7 + $0xa0] ss:$8 sps:$4 sm:$0xff]  }
  0x9f   : > { %934 = vmatpush2.bf16.msra.mxu1 %v2536_v14 }
  0xa0   : > { %574 = vmatpush2.bf16.msra.mxu0 %v2494_v45  ;;  %935 = vmatprep.subr.bf16.mxu1 %v2537_v42  ;;  %v2542_v45 = vld [vmem:[#allocation7 + $0x90] ss:$8 sps:$4 sm:$0xff]  }
  0xa1   : > { %575 = vmatprep.subr.bf16.mxu0 %v2495_v47  ;;  %v2545_v47 = vld [vmem:[#allocation7 + $0x80] ss:$8 sps:$4 sm:$0xff]   ;;  %v2558_v42 = vld [vmem:[#allocation8 + $0x98] ss:$12 sps:$4 sm:$0xff]  }
  0xa3   : > { %936 = vmatpush2.bf16.msra.mxu1 %v2539_v43 }
  0xa4   : > { %576 = vmatpush2.bf16.msra.mxu0 %v2497_v49  ;;  %937 = vmatprep.subr.bf16.mxu1 %v2540_v44  ;;  %v2547_v49 = vld [vmem:[#allocation8 + $0xa8] ss:$12 sps:$4 sm:$0xff]  }
  0xa5   : > { %1406 = vmatprep.subr.bf16.mxu0 %v2549_v50 }
  0xa7   : > { %578 = vmatmul.mubr.bf16.vlgmr.msra.gmra.mxu0 %v323_v57  ;;  %938 = vmatpush2.bf16.msra.mxu1 %v2542_v45  ;;  %v2565_v57 = vld [vmem:[#allocation8 + $0x4c] ss:$12 sps:$4 sm:$0xff]  }
  0xa8   : > { %587 = vmatprep.mubr.bf16.mxu0 %v326_v59  ;;  %939 = vmatprep.subr.bf16.mxu1 %v2543_v46  ;;  %v2569_v59 = vld [vmem:[#allocation8 + $0x34] ss:$12 sps:$4 sm:$0xff]  }
  0xa9   : > { %1407 = vmatpush1.bf16.msra.mxu0 %v2547_v49  ;;  %v2562_v45 = vld [vmem:[#allocation8 + $0x140] ss:$12 sps:$4 sm:$0xff]  }
  0xaa   : > { %1408 = vmatprep.subr.bf16.mxu0 %v2553_v51  ;;  %v2566_v51 = vld [vmem:[#allocation8 + $0x80] ss:$12 sps:$4 sm:$0xff]  }
  0xab   : > { %940 = vmatpush2.bf16.msra.mxu1 %v2545_v47 }
  0xac   : > { %2299 = vmatprep.subr.bf16.mxu1 %v2546_v48 }
  0xad   : > { %1409 = vmatpush1.bf16.msra.mxu0 %v2551_v52 }
  0xae   : > { %1410 = vmatprep.subr.bf16.mxu0 %v2557_v53 }
  0xaf   : > { %588 = vmatmul.mubr.bf16.gmra.mxu0 %v325_v3  ;;  %v2585_v3 = vld [vmem:[#allocation8 + $0x154] ss:$12 sps:$4 sm:$0xff]  }
  0xb0   : > { %597 = vmatprep.mubr.bf16.mxu0 %v328_v5  ;;  %v2589_v5 = vld [vmem:[#allocation8 + $0x13c] ss:$12 sps:$4 sm:$0xff]  }
  0xb1   : > { %1411 = vmatpush1.bf16.msra.mxu0 %v2555_v54  ;;  %v2570_v54 = vld [vmem:[#allocation8 + $0x128] ss:$12 sps:$4 sm:$0xff]  }
  0xb2   : > { %1412 = vmatprep.subr.bf16.mxu0 %v2561_v55 }
  0xb5   : > { %1413 = vmatpush1.bf16.msra.mxu0 %v2559_v56 }
  0xb6   : > { %1414 = vmatprep.subr.bf16.mxu0 %v2565_v57 }
  0xb7   : > { %598 = vmatmul.mubr.bf16.gmra.mxu0 %v327_v12  ;;  %v3082_v12 = vshrl.u32 %v375_v11, 7 }
  0xb8   : > { %607 = vmatprep.mubr.bf16.mxu0 %v330_v13 }
  0xb9   : > { %1415 = vmatpush1.bf16.msra.mxu0 %v2563_v58  ;;  %v3085_v13 = vsub.s32 1, %v3082_v12  ;;  %v3088_v14 = vsub.s32 0, %v3082_v12 }
  0xba   : > { %1416 = vmatprep.subr.bf16.mxu0 %v2569_v59 }
  0xbb   : > { %v3094_v17 = vrot.slane %v339_v15, %v3085_v13  ;;  %v3097_v18 = vrot.slane %v339_v15, %v3088_v14 }
  0xbd   : > { %1417 = vmatpush1.bf16.msra.mxu0 %v2567_v60  ;;  %v2574_v60 = vld [vmem:[#allocation8 + $0x68] ss:$12 sps:$4 sm:$0xff]  }
  0xbe   : > { %1418 = vmatprep.subr.bf16.mxu0 %v2573_v61 }
  0xbf   : > { %608 = vmatmul.mubr.bf16.gmra.mxu0 %v329_v19 }
  0xc0   : > { %617 = vmatprep.mubr.bf16.mxu0 %v332_v20 }
  0xc1   : > { %1419 = vmatpush1.bf16.msra.mxu0 %v2571_v62 }
  0xc2   : > { %1420 = vmatprep.subr.bf16.mxu0 %v2577_v63  ;;  %v2578_v63 = vld [vmem:[#allocation8 + $0x110] ss:$12 sps:$4 sm:$0xff]  }
  0xc5   : > { %1421 = vmatpush1.bf16.msra.mxu0 %v2575_v0 }
  0xc6   : > { %1422 = vmatprep.subr.bf16.mxu0 %v2581_v1 }
  0xc7   : > { %618 = vmatmul.mubr.bf16.gmra.mxu0 %v331_v25 }
  0xc8   : > { %627 = vmatprep.mubr.bf16.mxu0 %v334_v26 }
  0xc9   : > { %1423 = vmatpush2.bf16.msra.mxu0 %v2579_v2 }
  0xca   : > { %1424 = vmatprep.subr.bf16.mxu0 %v2585_v3 }
  0xcd   : > { %1425 = vmatpush2.bf16.msra.mxu0 %v2583_v4 }
  0xce   : > { %1426 = vmatprep.subr.bf16.mxu0 %v2589_v5  ;;  %v2582_v5 = vld [vmem:[#allocation8 + $0x50] ss:$12 sps:$4 sm:$0xff]  }
  0xcf   : > { %628 = vmatmul.mubr.bf16.gmra.mxu0 %v333_v31 }
  0xd0   : > { %637 = vmatprep.mubr.bf16.mxu0 %v336_v32 }
  0xd1   : > { %1427 = vmatpush2.bf16.msra.mxu0 %v2587_v6 }
  0xd2   : > { %1428 = vmatprep.subr.bf16.mxu0 %v2593_v7 }
  0xd5   : > { %1429 = vmatpush2.bf16.msra.mxu0 %v2591_v8  ;;  %v2586_v8 = vld [vmem:[#allocation8 + $0xf8] ss:$12 sps:$4 sm:$0xff]  }
  0xd6   : > { %1430 = vmatprep.subr.bf16.mxu0 %v2597_v9 }
  0xd7   : > { %638 = vmatmul.mubr.bf16.gmra.mxu0 %v335_v37 }
  0xd8   : > { %647 = vmatprep.mubr.bf16.mxu0 %v338_v38 }
  0xd9   : > { %1431 = vmatpush2.bf16.msra.mxu0 %v2595_v10 }
  0xdf   : > { %648 = vmatmul.mubr.bf16.gmra.mxu0 %v337_v41 }
 0x167   : > { %v579_v16 = vpop.f32.mrf.mxu0 }
 0x168   : > { %v580_v23 = vadd.f32 %v579_v16, %v3097_v18 }
 0x169   : > { %v581_v19 = vpop.f32.mrf.mxu0 }
 0x16a   : > { %v582_v21 = vadd.f32 %v581_v19, %v3094_v17  ;;  %v658_v30 = vmax.f32 %v580_v23, 0.0  ;;  %v2590_v19 = vld [vmem:[#allocation8 + $0x38] ss:$12 sps:$4 sm:$0xff]  }
 0x16b   : > { %v583_v20 = vpop.f32.mrf.mxu0 }
 0x16c   : > { %v584_v22 = vadd.f32 %v583_v20, %v3097_v18  ;;  %v659_v28 = vmax.f32 %v582_v21, 0.0 }
 0x16d   : > { %v585_v24 = vpop.f32.mrf.mxu0 }
 0x16e   : > { %v586_v25 = vadd.f32 %v585_v24, %v3094_v17  ;;  %v660_v26 = vmax.f32 %v584_v22, 0.0  ;;  %v2594_v22 = vld [vmem:[#allocation8 + $0xe0] ss:$12 sps:$4 sm:$0xff]  }
 0x16f   : > { %v589_v27 = vpop.f32.mrf.mxu0 }
 0x170   : > { %v661_v29 = vmax.f32 %v586_v25, 0.0  ;;  %v690_v34 = vpack.c.bf16 %v660_v26, %v658_v30  ;;  %v590_v39 = vadd.f32 %v589_v27, %v3097_v18 }
 0x171   : > { %v591_v31 = vpop.f32.mrf.mxu0 }
 0x172   : > { %v691_v32 = vpack.c.bf16 %v661_v29, %v659_v28  ;;  %v592_v37 = vadd.f32 %v591_v31, %v3094_v17  ;;  %v662_v48 = vmax.f32 %v590_v39, 0.0  ;;  %v2598_v28 = vld [vmem:[#allocation8 + $0x20] ss:$12 sps:$4 sm:$0xff]  }
 0x173   : > { %v593_v35 = vpop.f32.mrf.mxu0 }
 0x174   : > { %v594_v38 = vadd.f32 %v593_v35, %v3097_v18  ;;  %941 = vmatprep.mubr.bf16.mxu1 %v691_v32  ;;  %v663_v46 = vmax.f32 %v592_v37, 0.0 }
 0x175   : > { %v595_v40 = vpop.f32.mrf.mxu0  ;;  %942 = vmatmul.mubr.bf16.vlgmr.msra.gmra.mxu1 %v690_v34 }
 0x176   : > { %v596_v41 = vadd.f32 %v595_v40, %v3094_v17  ;;  %2300 = vmatpush3.bf16.msra.mxu1 %v2550_v33  ;;  %v664_v43 = vmax.f32 %v594_v38, 0.0 }
 0x177   : > { %v599_v44 = vpop.f32.mrf.mxu0  ;;  %2301 = vmatprep.subr.bf16.mxu1 %v2554_v36 }
 0x178   : > { %v665_v47 = vmax.f32 %v596_v41, 0.0  ;;  %v692_v52 = vpack.c.bf16 %v664_v43, %v662_v48  ;;  %v600_v57 = vadd.f32 %v599_v44, %v3097_v18 }
 0x179   : > { %v601_v49 = vpop.f32.mrf.mxu0 }
 0x17a   : > { %v693_v50 = vpack.c.bf16 %v665_v47, %v663_v46  ;;  %2302 = vmatpush3.bf16.msra.mxu1 %v2558_v42  ;;  %v602_v55 = vadd.f32 %v601_v49, %v3094_v17  ;;  %v666_v2 = vmax.f32 %v600_v57, 0.0 }
 0x17b   : > { %v603_v53 = vpop.f32.mrf.mxu0  ;;  %2303 = vmatprep.subr.bf16.mxu1 %v2562_v45 }
 0x17c   : > { %v604_v56 = vadd.f32 %v603_v53, %v3097_v18  ;;  %951 = vmatprep.mubr.bf16.mxu1 %v693_v50  ;;  %v667_v0 = vmax.f32 %v602_v55, 0.0 }
 0x17d   : > { %v605_v58 = vpop.f32.mrf.mxu0  ;;  %952 = vmatmul.mubr.bf16.gmra.mxu1 %v692_v52 }
 0x17e   : > { %v606_v59 = vadd.f32 %v605_v58, %v3094_v17  ;;  %2304 = vmatpush3.bf16.msra.mxu1 %v2566_v51  ;;  %v668_v61 = vmax.f32 %v604_v56, 0.0 }
 0x17f   : > { %v609_v62 = vpop.f32.mrf.mxu0  ;;  %2305 = vmatprep.subr.bf16.mxu1 %v2570_v54 }
 0x180   : > { %v669_v1 = vmax.f32 %v606_v59, 0.0  ;;  %v694_v6 = vpack.c.bf16 %v668_v61, %v666_v2  ;;  %v610_v11 = vadd.f32 %v609_v62, %v3097_v18 }
 0x181   : > { %v611_v3 = vpop.f32.mrf.mxu0 }
 0x182   : > { %v695_v4 = vpack.c.bf16 %v669_v1, %v667_v0  ;;  %2306 = vmatpush3.bf16.msra.mxu1 %v2574_v60  ;;  %v612_v9 = vadd.f32 %v611_v3, %v3094_v17  ;;  %v670_v25 = vmax.f32 %v610_v11, 0.0 }
 0x183   : > { %v613_v7 = vpop.f32.mrf.mxu0  ;;  %2307 = vmatprep.subr.bf16.mxu1 %v2578_v63 }
 0x184   : > { %v614_v10 = vadd.f32 %v613_v7, %v3097_v18  ;;  %961 = vmatprep.mubr.bf16.mxu1 %v695_v4  ;;  %v671_v23 = vmax.f32 %v612_v9, 0.0 }
 0x185   : > { %v615_v15 = vpop.f32.mrf.mxu0  ;;  %962 = vmatmul.mubr.bf16.gmra.mxu1 %v694_v6 }
 0x186   : > { %v616_v16 = vadd.f32 %v615_v15, %v3094_v17  ;;  %2308 = vmatpush3.bf16.msra.mxu1 %v2582_v5  ;;  %v672_v20 = vmax.f32 %v614_v10, 0.0 }
 0x187   : > { %v619_v21 = vpop.f32.mrf.mxu0  ;;  %2309 = vmatprep.subr.bf16.mxu1 %v2586_v8 }
 0x188   : > { %v673_v24 = vmax.f32 %v616_v16, 0.0  ;;  %v696_v29 = vpack.c.bf16 %v672_v20, %v670_v25  ;;  %v620_v33 = vadd.f32 %v619_v21, %v3097_v18  ;;  %v2601_v25 = vld [vmem:[#allocation8 + $0xf4] ss:$12 sps:$4 sm:$0xff]  }
 0x189   : > { %v621_v26 = vpop.f32.mrf.mxu0  ;;  %1432 = vmatprep.subr.bf16.mxu0 %v2601_v25 }
 0x18a   : > { %v697_v27 = vpack.c.bf16 %v673_v24, %v671_v23  ;;  %2310 = vmatpush3.bf16.msra.mxu1 %v2590_v19  ;;  %v622_v31 = vadd.f32 %v621_v26, %v3094_v17  ;;  %v674_v40 = vmax.f32 %v620_v33, 0.0  ;;  %v2599_v26 = vld [vmem:[#allocation8 + $0xf0] ss:$12 sps:$4 sm:$0xff]  }
 0x18b   : > { %v623_v30 = vpop.f32.mrf.mxu0  ;;  %2311 = vmatprep.subr.bf16.mxu1 %v2594_v22  ;;  %1433 = vmatpush2.bf16.msra.mxu0 %v2599_v26 }
 0x18c   : > { %v624_v32 = vadd.f32 %v623_v30, %v3097_v18  ;;  %971 = vmatprep.mubr.bf16.mxu1 %v697_v27  ;;  %v675_v38 = vmax.f32 %v622_v31, 0.0  ;;  %v2605_v27 = vld [vmem:[#allocation8 + $0xdc] ss:$12 sps:$4 sm:$0xff]   ;;  %v340_v31 = vld [vmem:[%s3513_s4 + $0x2] sm:$0x3] }
 0x18d   : > { %v625_v34 = vpop.f32.mrf.mxu0  ;;  %972 = vmatmul.mubr.bf16.gmra.mxu1 %v696_v29  ;;  %1434 = vmatprep.subr.bf16.mxu0 %v2605_v27  ;;  %v2609_v29 = vld [vmem:[#allocation8 + $0xc4] ss:$12 sps:$4 sm:$0xff]   ;;  %v2606_v30 = vld [vmem:[#allocation8 + $0x8] ss:$12 sps:$4 sm:$0xff]   ;;  %v3135_v33 = vrot.slane %v340_v31, %v3085_v13 }
 0x18e   : > { %v626_v35 = vadd.f32 %v625_v34, %v3094_v17  ;;  %2312 = vmatpush3.bf16.msra.mxu1 %v2598_v28  ;;  %v676_v36 = vmax.f32 %v624_v32, 0.0  ;;  %v2603_v28 = vld [vmem:[#allocation8 + $0xd8] ss:$12 sps:$4 sm:$0xff]   ;;  %v3138_v34 = vrot.slane %v340_v31, %v3088_v14 }
 0x18f   : > { %v629_v37 = vpop.f32.mrf.mxu0  ;;  %1435 = vmatpush2.bf16.msra.mxu0 %v2603_v28 }
 0x190   : > { %v677_v39 = vmax.f32 %v626_v35, 0.0  ;;  %v698_v43 = vpack.c.bf16 %v676_v36, %v674_v40  ;;  %v630_v47 = vadd.f32 %v629_v37, %v3097_v18  ;;  %1436 = vmatprep.subr.bf16.mxu0 %v2609_v29 }
 0x191   : > { %v631_v41 = vpop.f32.mrf.mxu0 }
 0x192   : > { %v699_v42 = vpack.c.bf16 %v677_v39, %v675_v38  ;;  %v632_v45 = vadd.f32 %v631_v41, %v3094_v17  ;;  %v678_v54 = vmax.f32 %v630_v47, 0.0 }
 0x193   : > { %v633_v44 = vpop.f32.mrf.mxu0 }
 0x194   : > { %v634_v46 = vadd.f32 %v633_v44, %v3097_v18  ;;  %981 = vmatprep.mubr.bf16.mxu1 %v699_v42  ;;  %v679_v52 = vmax.f32 %v632_v45, 0.0 }
 0x195   : > { %v635_v48 = vpop.f32.mrf.mxu0  ;;  %982 = vmatmul.mubr.bf16.gmra.mxu1 %v698_v43 }
 0x196   : > { %v636_v49 = vadd.f32 %v635_v48, %v3094_v17  ;;  %v680_v50 = vmax.f32 %v634_v46, 0.0 }
 0x197   : > { %v639_v51 = vpop.f32.mrf.mxu0 }
 0x198   : > { %v681_v53 = vmax.f32 %v636_v49, 0.0  ;;  %v700_v57 = vpack.c.bf16 %v680_v50, %v678_v54  ;;  %v640_v61 = vadd.f32 %v639_v51, %v3097_v18 }
 0x199   : > { %v641_v55 = vpop.f32.mrf.mxu0 }
 0x19a   : > { %v701_v56 = vpack.c.bf16 %v681_v53, %v679_v52  ;;  %v642_v59 = vadd.f32 %v641_v55, %v3094_v17  ;;  %v682_v4 = vmax.f32 %v640_v61, 0.0 }
 0x19b   : > { %v643_v58 = vpop.f32.mrf.mxu0 }
 0x19c   : > { %v644_v60 = vadd.f32 %v643_v58, %v3097_v18  ;;  %991 = vmatprep.mubr.bf16.mxu1 %v701_v56  ;;  %v683_v2 = vmax.f32 %v642_v59, 0.0 }
 0x19d   : > { %v645_v62 = vpop.f32.mrf.mxu0  ;;  %992 = vmatmul.mubr.bf16.gmra.mxu1 %v700_v57 }
 0x19e   : > { %v646_v63 = vadd.f32 %v645_v62, %v3094_v17  ;;  %v684_v0 = vmax.f32 %v644_v60, 0.0 }
 0x19f   : > { %v649_v1 = vpop.f32.mrf.mxu0 }
 0x1a0   : > { %v685_v3 = vmax.f32 %v646_v63, 0.0  ;;  %v702_v7 = vpack.c.bf16 %v684_v0, %v682_v4  ;;  %v650_v11 = vadd.f32 %v649_v1, %v3097_v18 }
 0x1a1   : > { %v651_v5 = vpop.f32.mrf.mxu0 }
 0x1a2   : > { %v703_v6 = vpack.c.bf16 %v685_v3, %v683_v2  ;;  %v652_v9 = vadd.f32 %v651_v5, %v3094_v17  ;;  %v686_v22 = vmax.f32 %v650_v11, 0.0 }
 0x1a3   : > { %v653_v8 = vpop.f32.mrf.mxu0 }
 0x1a4   : > { %v654_v10 = vadd.f32 %v653_v8, %v3097_v18  ;;  %1001 = vmatprep.mubr.bf16.mxu1 %v703_v6  ;;  %v687_v20 = vmax.f32 %v652_v9, 0.0  ;;  %v2602_v18 = vld [vmem:[#allocation8 + $0xc8] ss:$12 sps:$4 sm:$0xff]  }
 0x1a5   : > { %v655_v15 = vpop.f32.mrf.mxu0  ;;  %1002 = vmatmul.mubr.bf16.gmra.mxu1 %v702_v7  ;;  %2313 = vmatprep.subr.bf16.mxu1 %v2602_v18 }
 0x1a6   : > { %v656_v16 = vadd.f32 %v655_v15, %v3094_v17  ;;  %v688_v19 = vmax.f32 %v654_v10, 0.0  ;;  %v2607_v17 = vld [vmem:[#allocation8 + $0xc0] ss:$12 sps:$4 sm:$0xff]   ;;  %2314 = vmatpush3.bf16.msra.mxu1 %v2606_v30 }
 0x1a7   : > { %1437 = vmatpush2.bf16.msra.mxu0 %v2607_v17 }
 0x1a8   : > { %v689_v21 = vmax.f32 %v656_v16, 0.0  ;;  %v704_v24 = vpack.c.bf16 %v688_v19, %v686_v22 }
 0x1aa   : > { %v705_v23 = vpack.c.bf16 %v689_v21, %v687_v20 }
 0x1ac   : > { %1011 = vmatprep.mubr.bf16.mxu1 %v705_v23 }
 0x1ad   : > { %1012 = vmatmul.mubr.bf16.gmra.mxu1 %v704_v24 }
 0x235   : > { %v943_v32 = vpop.f32.mrf.mxu1 }
 0x236   : > { %v944_v39 = vadd.f32 %v943_v32, %v3138_v34 }
 0x237   : > { %v945_v35 = vpop.f32.mrf.mxu1 }
 0x238   : > { %v946_v37 = vadd.f32 %v945_v35, %v3135_v33  ;;  %v1022_v46 = vmax.f32 %v944_v39, 0.0 }
 0x239   : > { %v947_v36 = vpop.f32.mrf.mxu1 }
 0x23a   : > { %v948_v38 = vadd.f32 %v947_v36, %v3138_v34  ;;  %v1023_v44 = vmax.f32 %v946_v37, 0.0 }
 0x23b   : > { %v949_v40 = vpop.f32.mrf.mxu1 }
 0x23c   : > { %v950_v41 = vadd.f32 %v949_v40, %v3135_v33  ;;  %v1024_v42 = vmax.f32 %v948_v38, 0.0 }
 0x23d   : > { %v953_v43 = vpop.f32.mrf.mxu1 }
 0x23e   : > { %v1025_v45 = vmax.f32 %v950_v41, 0.0  ;;  %v1054_v49 = vpack.c.bf16 %v1024_v42, %v1022_v46  ;;  %v954_v53 = vadd.f32 %v953_v43, %v3138_v34 }
 0x23f   : > { %v955_v47 = vpop.f32.mrf.mxu1 }
 0x240   : > { %v1055_v48 = vpack.c.bf16 %v1025_v45, %v1023_v44  ;;  %v956_v51 = vadd.f32 %v955_v47, %v3135_v33  ;;  %v1026_v60 = vmax.f32 %v954_v53, 0.0 }
 0x241   : > { %v957_v50 = vpop.f32.mrf.mxu1 }
 0x242   : > { %v958_v52 = vadd.f32 %v957_v50, %v3138_v34  ;;  %1438 = vmatprep.mubr.bf16.mxu0 %v1055_v48  ;;  %1551 = vmatprep.mubr.bf16.mxu1 %v1055_v48  ;;  %v1027_v58 = vmax.f32 %v956_v51, 0.0 }
 0x243   : > { %v959_v54 = vpop.f32.mrf.mxu1  ;;  %1439 = vmatmul.mubr.bf16.vlgmr.msra.gmra.mxu0 %v1054_v49  ;;  %1552 = vmatmul.mubr.bf16.vlgmr.msra.gmra.mxu1 %v1054_v49 }
 0x244   : > { %v960_v55 = vadd.f32 %v959_v54, %v3135_v33  ;;  %v1028_v56 = vmax.f32 %v958_v52, 0.0 }
 0x245   : > { %v963_v57 = vpop.f32.mrf.mxu1 }
 0x246   : > { %v1029_v59 = vmax.f32 %v960_v55, 0.0  ;;  %v1056_v63 = vpack.c.bf16 %v1028_v56, %v1026_v60  ;;  %v964_v3 = vadd.f32 %v963_v57, %v3138_v34 }
 0x247   : > { %v965_v61 = vpop.f32.mrf.mxu1 }
 0x248   : > { %v1057_v62 = vpack.c.bf16 %v1029_v59, %v1027_v58  ;;  %v966_v1 = vadd.f32 %v965_v61, %v3135_v33  ;;  %v1030_v10 = vmax.f32 %v964_v3, 0.0 }
 0x249   : > { %v967_v0 = vpop.f32.mrf.mxu1 }
 0x24a   : > { %v968_v2 = vadd.f32 %v967_v0, %v3138_v34  ;;  %1448 = vmatprep.mubr.bf16.mxu0 %v1057_v62  ;;  %1559 = vmatprep.mubr.bf16.mxu1 %v1057_v62  ;;  %v1031_v8 = vmax.f32 %v966_v1, 0.0 }
 0x24b   : > { %v969_v4 = vpop.f32.mrf.mxu1  ;;  %1449 = vmatmul.mubr.bf16.gmra.mxu0 %v1056_v63  ;;  %1560 = vmatmul.mubr.bf16.gmra.mxu1 %v1056_v63 }
 0x24c   : > { %v970_v5 = vadd.f32 %v969_v4, %v3135_v33  ;;  %v1032_v6 = vmax.f32 %v968_v2, 0.0 }
 0x24d   : > { %v973_v7 = vpop.f32.mrf.mxu1 }
 0x24e   : > { %v1033_v9 = vmax.f32 %v970_v5, 0.0  ;;  %v1058_v16 = vpack.c.bf16 %v1032_v6, %v1030_v10  ;;  %v974_v22 = vadd.f32 %v973_v7, %v3138_v34 }
 0x24f   : > { %v975_v11 = vpop.f32.mrf.mxu1 }
 0x250   : > { %v1059_v15 = vpack.c.bf16 %v1033_v9, %v1031_v8  ;;  %v976_v20 = vadd.f32 %v975_v11, %v3135_v33  ;;  %v1034_v18 = vmax.f32 %v974_v22, 0.0 }
 0x251   : > { %v977_v19 = vpop.f32.mrf.mxu1 }
 0x252   : > { %v978_v21 = vadd.f32 %v977_v19, %v3138_v34  ;;  %1458 = vmatprep.mubr.bf16.mxu0 %v1059_v15  ;;  %1567 = vmatprep.mubr.bf16.mxu1 %v1059_v15  ;;  %v1035_v27 = vmax.f32 %v976_v20, 0.0 }
 0x253   : > { %v979_v23 = vpop.f32.mrf.mxu1  ;;  %1459 = vmatmul.mubr.bf16.gmra.mxu0 %v1058_v16  ;;  %1568 = vmatmul.mubr.bf16.gmra.mxu1 %v1058_v16 }
 0x254   : > { %v980_v24 = vadd.f32 %v979_v23, %v3135_v33  ;;  %v1036_v25 = vmax.f32 %v978_v21, 0.0 }
 0x255   : > { %v983_v26 = vpop.f32.mrf.mxu1 }
 0x256   : > { %v1037_v28 = vmax.f32 %v980_v24, 0.0  ;;  %v1060_v17 = vpack.c.bf16 %v1036_v25, %v1034_v18  ;;  %v984_v36 = vadd.f32 %v983_v26, %v3138_v34  ;;  %v1145_v18 = vsub.s32 2, %v3082_v12 }
 0x257   : > { %v985_v29 = vpop.f32.mrf.mxu1 }
 0x258   : > { %v1061_v30 = vpack.c.bf16 %v1037_v28, %v1035_v27  ;;  %v986_v32 = vadd.f32 %v985_v29, %v3135_v33  ;;  %v1038_v43 = vmax.f32 %v984_v36, 0.0 }
 0x259   : > { %v987_v31 = vpop.f32.mrf.mxu1 }
 0x25a   : > { %v988_v35 = vadd.f32 %v987_v31, %v3138_v34  ;;  %1468 = vmatprep.mubr.bf16.mxu0 %v1061_v30  ;;  %1575 = vmatprep.mubr.bf16.mxu1 %v1061_v30  ;;  %v1039_v41 = vmax.f32 %v986_v32, 0.0 }
 0x25b   : > { %v989_v37 = vpop.f32.mrf.mxu1  ;;  %1469 = vmatmul.mubr.bf16.gmra.mxu0 %v1060_v17  ;;  %1576 = vmatmul.mubr.bf16.gmra.mxu1 %v1060_v17 }
 0x25c   : > { %v990_v38 = vadd.f32 %v989_v37, %v3135_v33  ;;  %v1040_v39 = vmax.f32 %v988_v35, 0.0 }
 0x25d   : > { %v993_v40 = vpop.f32.mrf.mxu1 }
 0x25e   : > { %v1041_v42 = vmax.f32 %v990_v38, 0.0  ;;  %v1062_v46 = vpack.c.bf16 %v1040_v39, %v1038_v43  ;;  %v994_v50 = vadd.f32 %v993_v40, %v3138_v34  ;;  %v2642_v40 = vld [vmem:[%s3036_s8] sm:$0xff] }
 0x25f   : > { %v995_v44 = vpop.f32.mrf.mxu1 }
 0x260   : > { %v1063_v45 = vpack.c.bf16 %v1041_v42, %v1039_v41  ;;  %v996_v48 = vadd.f32 %v995_v44, %v3135_v33  ;;  %v1042_v57 = vmax.f32 %v994_v50, 0.0 }
 0x261   : > { %v997_v47 = vpop.f32.mrf.mxu1 }
 0x262   : > { %v998_v49 = vadd.f32 %v997_v47, %v3138_v34  ;;  %1478 = vmatprep.mubr.bf16.mxu0 %v1063_v45  ;;  %1583 = vmatprep.mubr.bf16.mxu1 %v1063_v45  ;;  %v1043_v55 = vmax.f32 %v996_v48, 0.0  ;;  %v2643_v47 = vld [vmem:[%s3036_s8 + $0x8] sm:$0xff] }
 0x263   : > { %v999_v51 = vpop.f32.mrf.mxu1  ;;  %1479 = vmatmul.mubr.bf16.gmra.mxu0 %v1062_v46  ;;  %1584 = vmatmul.mubr.bf16.gmra.mxu1 %v1062_v46 }
 0x264   : > { %v1000_v52 = vadd.f32 %v999_v51, %v3135_v33  ;;  %v1044_v53 = vmax.f32 %v998_v49, 0.0  ;;  %v2644_v51 = vld [vmem:[%s3036_s8 + $0x10] sm:$0xff] }
 0x265   : > { %v1003_v54 = vpop.f32.mrf.mxu1 }
 0x266   : > { %v1045_v56 = vmax.f32 %v1000_v52, 0.0  ;;  %v1064_v60 = vpack.c.bf16 %v1044_v53, %v1042_v57  ;;  %v1004_v0 = vadd.f32 %v1003_v54, %v3138_v34 }
 0x267   : > { %v1005_v58 = vpop.f32.mrf.mxu1 }
 0x268   : > { %v1065_v59 = vpack.c.bf16 %v1045_v56, %v1043_v55  ;;  %v1006_v62 = vadd.f32 %v1005_v58, %v3135_v33  ;;  %v1046_v7 = vmax.f32 %v1004_v0, 0.0 }
 0x269   : > { %v1007_v61 = vpop.f32.mrf.mxu1 }
 0x26a   : > { %v1008_v63 = vadd.f32 %v1007_v61, %v3138_v34  ;;  %1488 = vmatprep.mubr.bf16.mxu0 %v1065_v59  ;;  %1591 = vmatprep.mubr.bf16.mxu1 %v1065_v59  ;;  %v1047_v5 = vmax.f32 %v1006_v62, 0.0  ;;  %v2645_v59 = vld [vmem:[%s3036_s8 + $0x18] sm:$0xff] }
 0x26b   : > { %v1009_v1 = vpop.f32.mrf.mxu1  ;;  %1489 = vmatmul.mubr.bf16.gmra.mxu0 %v1064_v60  ;;  %1592 = vmatmul.mubr.bf16.gmra.mxu1 %v1064_v60 }
 0x26c   : > { %v1010_v2 = vadd.f32 %v1009_v1, %v3135_v33  ;;  %v1048_v3 = vmax.f32 %v1008_v63, 0.0 }
 0x26d   : > { %v1013_v4 = vpop.f32.mrf.mxu1 }
 0x26e   : > { %v1049_v6 = vmax.f32 %v1010_v2, 0.0  ;;  %v1066_v10 = vpack.c.bf16 %v1048_v3, %v1046_v7  ;;  %v1014_v19 = vadd.f32 %v1013_v4, %v3138_v34  ;;  %v2646_v7 = vld [vmem:[%s3036_s8 + $0x20] sm:$0xff] }
 0x26f   : > { %v1015_v8 = vpop.f32.mrf.mxu1 }
 0x270   : > { %v1067_v9 = vpack.c.bf16 %v1049_v6, %v1047_v5  ;;  %v1016_v15 = vadd.f32 %v1015_v8, %v3135_v33  ;;  %v1050_v25 = vmax.f32 %v1014_v19, 0.0 }
 0x271   : > { %v1017_v11 = vpop.f32.mrf.mxu1 }
 0x272   : > { %v1018_v16 = vadd.f32 %v1017_v11, %v3138_v34  ;;  %1498 = vmatprep.mubr.bf16.mxu0 %v1067_v9  ;;  %1599 = vmatprep.mubr.bf16.mxu1 %v1067_v9  ;;  %v1051_v23 = vmax.f32 %v1016_v15, 0.0  ;;  %v341_v34 = vld [vmem:[%s3513_s4 + $0x4] sm:$0x7] }
 0x273   : > { %v1019_v20 = vpop.f32.mrf.mxu1  ;;  %1499 = vmatmul.mubr.bf16.gmra.mxu0 %v1066_v10  ;;  %1600 = vmatmul.mubr.bf16.gmra.mxu1 %v1066_v10  ;;  %v3176_v28 = vrot.slane %v341_v34, %v3088_v14  ;;  %v3184_v31 = vrot.slane %v341_v34, %v1145_v18 }
 0x274   : > { %v1020_v21 = vadd.f32 %v1019_v20, %v3135_v33  ;;  %v1052_v22 = vmax.f32 %v1018_v16, 0.0  ;;  %v3181_v33 = vrot.slane %v341_v34, %v3085_v13 }
 0x276   : > { %v1053_v24 = vmax.f32 %v1020_v21, 0.0  ;;  %v1068_v27 = vpack.c.bf16 %v1052_v22, %v1050_v25  ;;  %v2647_v22 = vld [vmem:[%s3036_s8 + $0x28] sm:$0xff] }
 0x278   : > { %v1069_v26 = vpack.c.bf16 %v1053_v24, %v1051_v23 }
 0x27a   : > { %1508 = vmatprep.mubr.bf16.mxu0 %v1069_v26  ;;  %1607 = vmatprep.mubr.bf16.mxu1 %v1069_v26  ;;  %v2648_v26 = vld [vmem:[%s3036_s8 + $0x30] sm:$0xff] }
 0x27b   : > { %1509 = vmatmul.mubr.bf16.gmra.mxu0 %v1068_v27  ;;  %1608 = vmatmul.mubr.bf16.gmra.mxu1 %v1068_v27 }
 0x303   : > { %v1440_v29 = vpop.f32.mrf.mxu0  ;;  %v2315_v30 = vpop.f32.mrf.mxu1 }
 0x304   : > { %v1441_v17 = vadd.f32 %v1440_v29, %v3176_v28 }
 0x305   : > { %v1442_v32 = vpop.f32.mrf.mxu0  ;;  %v2316_v35 = vpop.f32.mrf.mxu1 }
 0x306   : > { %v2267_v36 = vpack.c.bf16 %v1441_v17, %v1441_v17  ;;  %v1443_v14 = vadd.f32 %v1442_v32, %v3181_v33  ;;  %v2317_v37 = vadd.f32 %v2316_v35, %v2315_v30  ;;  %v2649_v17 = vld [vmem:[%s3036_s8 + $0x38] sm:$0xff] }
 0x307   : > { %v1444_v38 = vpop.f32.mrf.mxu0  ;;  %v2318_v12 = vpop.f32.mrf.mxu1 }
 0x308   : > { %1824 = vst [vmem:[%s3187_s13] sm:$0xf] %v2267_v36  ;;  %v1554_v13 = vadd.f32 %v2317_v37, %v3184_v31  ;;  %v1445_v39 = vadd.f32 %v1444_v38, %v3176_v28  ;;  %v3193_v41 = vadd.f32 %v2642_v40, %v1443_v14 }
 0x309   : > { %v1446_v42 = vpop.f32.mrf.mxu0  ;;  %v2319_v43 = vpop.f32.mrf.mxu1 }
 0x30a   : > { %v2268_v44 = vpack.c.bf16 %v1445_v39, %v1445_v39  ;;  %v1447_v45 = vadd.f32 %v1446_v42, %v3181_v33  ;;  %v2320_v46 = vadd.f32 %v2319_v43, %v2318_v12  ;;  %v3197_v48 = vadd.f32 %v2643_v47, %v1554_v13  ;;  %v2650_v42 = vld [vmem:[%s3036_s8 + $0x40] sm:$0xff]  ;;  %v2651_v47 = vld [vmem:[%s3036_s8 + $0x48] sm:$0xff] }
 0x30b   : > { %v1450_v49 = vpop.f32.mrf.mxu0  ;;  %v2321_v50 = vpop.f32.mrf.mxu1  ;;  %v1648_v58 = vmul.f32 %v3193_v41, %v3193_v41 }
 0x30c   : > { %1825 = vst [vmem:[%s3187_s13 + $0xc] sm:$0xf] %v2268_v44  ;;  %v3201_v52 = vadd.f32 %v2644_v51, %v1447_v45  ;;  %v1557_v53 = vadd.f32 %v2320_v46, %v3184_v31  ;;  %v1451_v54 = vadd.f32 %v1450_v49, %v3176_v28  ;;  %v1649_v55 = vmul.f32 %v3197_v48, %v3197_v48 }
 0x30d   : > { %v1452_v56 = vpop.f32.mrf.mxu0  ;;  %v2322_v57 = vpop.f32.mrf.mxu1 }
 0x30e   : > { %v3210_v60 = vadd.f32 %v2645_v59, %v1557_v53  ;;  %v2269_v61 = vpack.c.bf16 %v1451_v54, %v1451_v54  ;;  %v1453_v62 = vadd.f32 %v1452_v56, %v3181_v33  ;;  %v2323_v63 = vadd.f32 %v2322_v57, %v2321_v50 }
 0x30f   : > { %v1454_v0 = vpop.f32.mrf.mxu0  ;;  %v2324_v1 = vpop.f32.mrf.mxu1  ;;  %v1680_v2 = vadd.f32 %v1649_v55, %v1648_v58  ;;  %v1650_v5 = vmul.f32 %v3201_v52, %v3201_v52 }
 0x310   : > { %1826 = vst [vmem:[%s3187_s13 + $0x18] sm:$0xf] %v2269_v61  ;;  %v1562_v3 = vadd.f32 %v2323_v63, %v3184_v31  ;;  %v1455_v4 = vadd.f32 %v1454_v0, %v3176_v28  ;;  %v1651_v6 = vmul.f32 %v3210_v60, %v3210_v60  ;;  %v3221_v8 = vadd.f32 %v2646_v7, %v1453_v62  ;;  %v2652_v61 = vld [vmem:[%s3036_s8 + $0x50] sm:$0xff] }
 0x311   : > { %1681 = vadd.xlane.f32.xlu0 %v1680_v2  ;;  %v1456_v9 = vpop.f32.mrf.mxu0  ;;  %v2325_v10 = vpop.f32.mrf.mxu1  ;;  %v2653_v2 = vld [vmem:[%s3036_s8 + $0x58] sm:$0xff] }
 0x312   : > { %v2270_v11 = vpack.c.bf16 %v1455_v4, %v1455_v4  ;;  %v1457_v15 = vadd.f32 %v1456_v9, %v3181_v33  ;;  %v2326_v16 = vadd.f32 %v2325_v10, %v2324_v1  ;;  %v1683_v19 = vadd.f32 %v1651_v6, %v1650_v5 }
 0x313   : > { %v1460_v20 = vpop.f32.mrf.mxu0  ;;  %v2327_v21 = vpop.f32.mrf.mxu1  ;;  %v3225_v23 = vadd.f32 %v2647_v22, %v1562_v3  ;;  %v1652_v29 = vmul.f32 %v3221_v8, %v3221_v8 }
 0x314   : > { %1827 = vst [vmem:[%s3187_s13 + $0x24] sm:$0xf] %v2270_v11  ;;  %v1565_v24 = vadd.f32 %v2326_v16, %v3184_v31  ;;  %v1461_v25 = vadd.f32 %v1460_v20, %v3176_v28  ;;  %v3231_v27 = vadd.f32 %v2648_v26, %v1457_v15 }
 0x315   : > { %1684 = vadd.xlane.f32.xlu0 %v1683_v19  ;;  %v1462_v34 = vpop.f32.mrf.mxu0  ;;  %v2328_v18 = vpop.f32.mrf.mxu1  ;;  %v1653_v30 = vmul.f32 %v3225_v23, %v3225_v23  ;;  %v2654_v19 = vld [vmem:[%s3036_s8 + $0x60] sm:$0xff] }
 0x316   : > { %v3238_v32 = vadd.f32 %v2649_v17, %v1565_v24  ;;  %v2271_v35 = vpack.c.bf16 %v1461_v25, %v1461_v25  ;;  %v1463_v36 = vadd.f32 %v1462_v34, %v3181_v33  ;;  %v2329_v14 = vadd.f32 %v2328_v18, %v2327_v21  ;;  %v2655_v25 = vld [vmem:[%s3036_s8 + $0x68] sm:$0xff] }
 0x317   : > { %v1464_v37 = vpop.f32.mrf.mxu0  ;;  %v2330_v38 = vpop.f32.mrf.mxu1  ;;  %v1686_v12 = vadd.f32 %v1653_v30, %v1652_v29  ;;  %v1654_v46 = vmul.f32 %v3231_v27, %v3231_v27 }
 0x318   : > { %1828 = vst [vmem:[%s3187_s13 + $0x30] sm:$0xf] %v2271_v35  ;;  %v1570_v13 = vadd.f32 %v2329_v14, %v3184_v31  ;;  %v1465_v39 = vadd.f32 %v1464_v37, %v3176_v28  ;;  %v1655_v40 = vmul.f32 %v3238_v32, %v3238_v32  ;;  %v3247_v43 = vadd.f32 %v2650_v42, %v1463_v36  ;;  %v2657_v42 = vld [vmem:[%s3036_s8 + $0x78] sm:$0xff] }
 0x319   : > { %1687 = vadd.xlane.f32.xlu1 %v1686_v12  ;;  %v1466_v44 = vpop.f32.mrf.mxu0  ;;  %v2331_v45 = vpop.f32.mrf.mxu1 }
 0x31a   : > { %v3252_v49 = vadd.f32 %v2651_v47, %v1570_v13  ;;  %v2272_v50 = vpack.c.bf16 %v1465_v39, %v1465_v39  ;;  %v1467_v51 = vadd.f32 %v1466_v44, %v3181_v33  ;;  %v2332_v53 = vadd.f32 %v2331_v45, %v2330_v38  ;;  %v2656_v38 = vld [vmem:[%s3036_s8 + $0x70] sm:$0xff] }
 0x31b   : > { %v1470_v54 = vpop.f32.mrf.mxu0  ;;  %v2333_v55 = vpop.f32.mrf.mxu1  ;;  %v1689_v56 = vadd.f32 %v1655_v40, %v1654_v46  ;;  %v1656_v1 = vmul.f32 %v3247_v43, %v3247_v43 }
 0x31c   : > { %1829 = vst [vmem:[%s3187_s13 + $0x3c] sm:$0xf] %v2272_v50  ;;  %v1573_v57 = vadd.f32 %v2332_v53, %v3184_v31  ;;  %v1471_v58 = vadd.f32 %v1470_v54, %v3176_v28  ;;  %v1657_v59 = vmul.f32 %v3252_v49, %v3252_v49  ;;  %v3261_v62 = vadd.f32 %v2652_v61, %v1467_v51 }
 0x31d   : > { %1690 = vadd.xlane.f32.xlu1 %v1689_v56  ;;  %v1472_v63 = vpop.f32.mrf.mxu0  ;;  %v2334_v0 = vpop.f32.mrf.mxu1 }
 0x31e   : > { %v3266_v3 = vadd.f32 %v2653_v2, %v1573_v57  ;;  %v2273_v4 = vpack.c.bf16 %v1471_v58, %v1471_v58  ;;  %v1473_v5 = vadd.f32 %v1472_v63, %v3181_v33  ;;  %v2335_v6 = vadd.f32 %v2334_v0, %v2333_v55  ;;  %v2658_v57 = vld [vmem:[%s3036_s8 + $0x80] sm:$0xff]  ;;  %v2659_v0 = vld [vmem:[%s3036_s8 + $0x88] sm:$0xff] }
 0x31f   : > { %v1474_v7 = vpop.f32.mrf.mxu0  ;;  %v2336_v9 = vpop.f32.mrf.mxu1  ;;  %v1692_v10 = vadd.f32 %v1657_v59, %v1656_v1  ;;  %v1658_v24 = vmul.f32 %v3261_v62, %v3261_v62 }
 0x320   : > { %1830 = vst [vmem:[%s3187_s13 + $0x48] sm:$0xf] %v2273_v4  ;;  %v1578_v11 = vadd.f32 %v2335_v6, %v3184_v31  ;;  %v1475_v15 = vadd.f32 %v1474_v7, %v3176_v28  ;;  %v1659_v16 = vmul.f32 %v3266_v3, %v3266_v3  ;;  %v3275_v20 = vadd.f32 %v2654_v19, %v1473_v5 }
 0x321   : > { %1693 = vadd.xlane.f32.xlu0 %v1692_v10  ;;  %v1476_v21 = vpop.f32.mrf.mxu0  ;;  %v2337_v22 = vpop.f32.mrf.mxu1 }
 0x322   : > { %v3280_v26 = vadd.f32 %v2655_v25, %v1578_v11  ;;  %v2274_v34 = vpack.c.bf16 %v1475_v15, %v1475_v15  ;;  %v1477_v18 = vadd.f32 %v1476_v21, %v3181_v33  ;;  %v2338_v29 = vadd.f32 %v2337_v22, %v2336_v9  ;;  %v2661_v25 = vld [vmem:[%s3036_s8 + $0x98] sm:$0xff] }
 0x323   : > { %v1480_v30 = vpop.f32.mrf.mxu0  ;;  %v2339_v17 = vpop.f32.mrf.mxu1  ;;  %v1695_v35 = vadd.f32 %v1659_v16, %v1658_v24  ;;  %v1660_v40 = vmul.f32 %v3275_v20, %v3275_v20  ;;  %v2660_v16 = vld [vmem:[%s3036_s8 + $0x90] sm:$0xff] }
 0x324   : > { %1831 = vst [vmem:[%s3187_s13 + $0x54] sm:$0xf] %v2274_v34  ;;  %v1581_v36 = vadd.f32 %v2338_v29, %v3184_v31  ;;  %v1481_v14 = vadd.f32 %v1480_v30, %v3176_v28  ;;  %v1661_v37 = vmul.f32 %v3280_v26, %v3280_v26  ;;  %v3289_v12 = vadd.f32 %v2656_v38, %v1477_v18 }
 0x325   : > { %1696 = vadd.xlane.f32.xlu1 %v1695_v35  ;;  %v1482_v13 = vpop.f32.mrf.mxu0  ;;  %v2340_v39 = vpop.f32.mrf.mxu1 }
 0x326   : > { %v3294_v44 = vadd.f32 %v2657_v42, %v1581_v36  ;;  %v2275_v45 = vpack.c.bf16 %v1481_v14, %v1481_v14  ;;  %v1483_v46 = vadd.f32 %v1482_v13, %v3181_v33  ;;  %v2341_v47 = vadd.f32 %v2340_v39, %v2339_v17  ;;  %v2662_v13 = vld [vmem:[%s3036_s8 + $0xa0] sm:$0xff] }
 0x327   : > { %v1484_v50 = vpop.f32.mrf.mxu0  ;;  %v2342_v51 = vpop.f32.mrf.mxu1  ;;  %v1698_v53 = vadd.f32 %v1661_v37, %v1660_v40  ;;  %v1662_v63 = vmul.f32 %v3289_v12, %v3289_v12 }
 0x328   : > { %1832 = vst [vmem:[%s3187_s13 + $0x60] sm:$0xf] %v2275_v45  ;;  %v1586_v54 = vadd.f32 %v2341_v47, %v3184_v31  ;;  %v1485_v55 = vadd.f32 %v1484_v50, %v3176_v28  ;;  %v1663_v56 = vmul.f32 %v3294_v44, %v3294_v44  ;;  %v3303_v58 = vadd.f32 %v2658_v57, %v1483_v46  ;;  %v2663_v46 = vld [vmem:[%s3036_s8 + $0xa8] sm:$0xff] }
 0x329   : > { %1699 = vadd.xlane.f32.xlu0 %v1698_v53  ;;  %v1486_v59 = vpop.f32.mrf.mxu0  ;;  %v2343_v61 = vpop.f32.mrf.mxu1 }
 0x32a   : > { %v3308_v1 = vadd.f32 %v2659_v0, %v1586_v54  ;;  %v2276_v2 = vpack.c.bf16 %v1485_v55, %v1485_v55  ;;  %v1487_v4 = vadd.f32 %v1486_v59, %v3181_v33  ;;  %v2344_v5 = vadd.f32 %v2343_v61, %v2342_v51 }
 0x32b   : > { %v1490_v6 = vpop.f32.mrf.mxu0  ;;  %v2345_v7 = vpop.f32.mrf.mxu1  ;;  %v1701_v9 = vadd.f32 %v1663_v56, %v1662_v63  ;;  %v1664_v24 = vmul.f32 %v3303_v58, %v3303_v58  ;;  %v2664_v63 = vld [vmem:[%s3036_s8 + $0xb0] sm:$0xff] }
 0x32c   : > { %1833 = vst [vmem:[%s3187_s13 + $0x6c] sm:$0xf] %v2276_v2  ;;  %v1589_v10 = vadd.f32 %v2344_v5, %v3184_v31  ;;  %v1491_v11 = vadd.f32 %v1490_v6, %v3176_v28  ;;  %v1665_v15 = vmul.f32 %v3308_v1, %v3308_v1  ;;  %v3317_v19 = vadd.f32 %v2660_v16, %v1487_v4  ;;  %v2665_v6 = vld [vmem:[%s3036_s8 + $0xb8] sm:$0xff] }
 0x32d   : > { %1702 = vadd.xlane.f32.xlu1 %v1701_v9  ;;  %v1492_v21 = vpop.f32.mrf.mxu0  ;;  %v2346_v22 = vpop.f32.mrf.mxu1 }
 0x32e   : > { %v3322_v34 = vadd.f32 %v2661_v25, %v1589_v10  ;;  %v2277_v18 = vpack.c.bf16 %v1491_v11, %v1491_v11  ;;  %v1493_v29 = vadd.f32 %v1492_v21, %v3181_v33  ;;  %v2347_v30 = vadd.f32 %v2346_v22, %v2345_v7 }
 0x32f   : > { %v1494_v17 = vpop.f32.mrf.mxu0  ;;  %v2348_v35 = vpop.f32.mrf.mxu1  ;;  %v1704_v36 = vadd.f32 %v1665_v15, %v1664_v24  ;;  %v1666_v45 = vmul.f32 %v3317_v19, %v3317_v19 }
 0x330   : > { %1834 = vst [vmem:[%s3187_s13 + $0x78] sm:$0xf] %v2277_v18  ;;  %v1594_v14 = vadd.f32 %v2347_v30, %v3184_v31  ;;  %v1495_v37 = vadd.f32 %v1494_v17, %v3176_v28  ;;  %v1667_v38 = vmul.f32 %v3322_v34, %v3322_v34  ;;  %v3331_v39 = vadd.f32 %v2662_v13, %v1493_v29  ;;  %v2666_v18 = vld [vmem:[%s3036_s8 + $0xc0] sm:$0xff] }
 0x331   : > { %1705 = vadd.xlane.f32.xlu0 %v1704_v36  ;;  %v1496_v40 = vpop.f32.mrf.mxu0  ;;  %v2349_v42 = vpop.f32.mrf.mxu1  ;;  %v2667_v36 = vld [vmem:[%s3036_s8 + $0xc8] sm:$0xff] }
 0x332   : > { %v3336_v47 = vadd.f32 %v2663_v46, %v1594_v14  ;;  %v2278_v50 = vpack.c.bf16 %v1495_v37, %v1495_v37  ;;  %v1497_v51 = vadd.f32 %v1496_v40, %v3181_v33  ;;  %v2350_v53 = vadd.f32 %v2349_v42, %v2348_v35 }
 0x333   : > { %v1500_v54 = vpop.f32.mrf.mxu0  ;;  %v2351_v55 = vpop.f32.mrf.mxu1  ;;  %v1707_v56 = vadd.f32 %v1667_v38, %v1666_v45  ;;  %v1668_v5 = vmul.f32 %v3331_v39, %v3331_v39 }
 0x334   : > { %1835 = vst [vmem:[%s3187_s13 + $0x84] sm:$0xf] %v2278_v50  ;;  %v1597_v57 = vadd.f32 %v2350_v53, %v3184_v31  ;;  %v1501_v59 = vadd.f32 %v1500_v54, %v3176_v28  ;;  %v1669_v61 = vmul.f32 %v3336_v47, %v3336_v47  ;;  %v3345_v0 = vadd.f32 %v2664_v63, %v1497_v51  ;;  %v2668_v53 = vld [vmem:[%s3036_s8 + $0xd0] sm:$0xff] }
 0x335   : > { %1708 = vadd.xlane.f32.xlu1 %v1707_v56  ;;  %v1502_v2 = vpop.f32.mrf.mxu0  ;;  %v2352_v4 = vpop.f32.mrf.mxu1 }
 0x336   : > { %v3350_v7 = vadd.f32 %v2665_v6, %v1597_v57  ;;  %v2279_v9 = vpack.c.bf16 %v1501_v59, %v1501_v59  ;;  %v1503_v10 = vadd.f32 %v1502_v2, %v3181_v33  ;;  %v2353_v11 = vadd.f32 %v2352_v4, %v2351_v55  ;;  %v2669_v59 = vld [vmem:[%s3036_s8 + $0xd8] sm:$0xff] }
 0x337   : > { %v1504_v15 = vpop.f32.mrf.mxu0  ;;  %v2354_v16 = vpop.f32.mrf.mxu1  ;;  %v1710_v21 = vadd.f32 %v1669_v61, %v1668_v5  ;;  %v1670_v35 = vmul.f32 %v3345_v0, %v3345_v0 }
 0x338   : > { %1836 = vst [vmem:[%s3187_s13 + $0x90] sm:$0xf] %v2279_v9  ;;  %v1602_v22 = vadd.f32 %v2353_v11, %v3184_v31  ;;  %v1505_v24 = vadd.f32 %v1504_v15, %v3176_v28  ;;  %v1671_v25 = vmul.f32 %v3350_v7, %v3350_v7  ;;  %v3359_v29 = vadd.f32 %v2666_v18, %v1503_v10  ;;  %v2670_v10 = vld [vmem:[%s3036_s8 + $0xe0] sm:$0xff]  ;;  %v2671_v18 = vld [vmem:[%s3036_s8 + $0xe8] sm:$0xff] }
 0x339   : > { %1711 = vadd.xlane.f32.xlu0 %v1710_v21  ;;  %v1506_v30 = vpop.f32.mrf.mxu0  ;;  %v2355_v17 = vpop.f32.mrf.mxu1 }
 0x33a   : > { %v3364_v14 = vadd.f32 %v2667_v36, %v1602_v22  ;;  %v2280_v37 = vpack.c.bf16 %v1505_v24, %v1505_v24  ;;  %v1507_v38 = vadd.f32 %v1506_v30, %v3181_v33  ;;  %v2356_v13 = vadd.f32 %v2355_v17, %v2354_v16 }
 0x33b   : > { %v1510_v40 = vpop.f32.mrf.mxu0  ;;  %v2357_v42 = vpop.f32.mrf.mxu1  ;;  %v1713_v45 = vadd.f32 %v1671_v25, %v1670_v35  ;;  %v1672_v57 = vmul.f32 %v3359_v29, %v3359_v29 }
 0x33c   : > { %1837 = vst [vmem:[%s3187_s13 + $0x9c] sm:$0xf] %v2280_v37  ;;  %v1605_v46 = vadd.f32 %v2356_v13, %v3184_v31  ;;  %v1511_v50 = vadd.f32 %v1510_v40, %v3176_v28  ;;  %v1673_v51 = vmul.f32 %v3364_v14, %v3364_v14  ;;  %v3373_v54 = vadd.f32 %v2668_v53, %v1507_v38 }
 0x33d   : > { %1714 = vadd.xlane.f32.xlu1 %v1713_v45  ;;  %v1512_v55 = vpop.f32.mrf.mxu0  ;;  %v2358_v56 = vpop.f32.mrf.mxu1  ;;  %v2673_v45 = vld [vmem:[%s3036_s8 + $0xf8] sm:$0xff] }
 0x33e   : > { %v3378_v61 = vadd.f32 %v2669_v59, %v1605_v46  ;;  %v2281_v63 = vpack.c.bf16 %v1511_v50, %v1511_v50  ;;  %v1513_v2 = vadd.f32 %v1512_v55, %v3181_v33  ;;  %v2359_v4 = vadd.f32 %v2358_v56, %v2357_v42 }
 0x33f   : > { %v1514_v5 = vpop.f32.mrf.mxu0  ;;  %v2360_v6 = vpop.f32.mrf.mxu1  ;;  %v1716_v9 = vadd.f32 %v1673_v51, %v1672_v57  ;;  %v1674_v25 = vmul.f32 %v3373_v54, %v3373_v54 }
 0x340   : > { %1838 = vst [vmem:[%s3187_s13 + $0xa8] sm:$0xf] %v2281_v63  ;;  %v3383_v11 = vadd.f32 %v2670_v10, %v1513_v2  ;;  %v1610_v15 = vadd.f32 %v2359_v4, %v3184_v31  ;;  %v1515_v16 = vadd.f32 %v1514_v5, %v3176_v28  ;;  %v1675_v21 = vmul.f32 %v3378_v61, %v3378_v61  ;;  %v2672_v28 = vld [vmem:[%s3036_s8 + $0xf0] sm:$0xff]  ;;  %s2864_s8 = smov [#allocation10]  }
 0x341   : > { %1717 = vadd.xlane.f32.xlu0 %v1716_v9  ;;  %v1516_v22 = vpop.f32.mrf.mxu0  ;;  %v2361_v24 = vpop.f32.mrf.mxu1  ;;  %s2784_s24 = sshll.u32 %s2864_s8, 4  ;;  %s2785_s24 = int_to_ptr.vmem [resolvable:$false] %s2784_s24 }
 0x342   : > { %v3392_v30 = vadd.f32 %v2671_v18, %v1610_v15  ;;  %v2282_v17 = vpack.c.bf16 %v1515_v16, %v1515_v16  ;;  %v1517_v35 = vadd.f32 %v1516_v22, %v3181_v33  ;;  %v2362_v36 = vadd.f32 %v2361_v24, %v2360_v6  ;;  %s2786_s26 = scalar_lea.vmem %s2785_s24, 6144  ;;  %p2787_p5 = scmp.lt.s32.totalorder %s3465_s16, %s2785_s24 }
 0x343   : > { %v1719_v37 = vadd.f32 %v1675_v21, %v1674_v25  ;;  %v1676_v40 = vmul.f32 %v3383_v11, %v3383_v11  ;;  %p2788_p3 = scmp.lt.s32.totalorder %s2786_s26, %s2780_s12 }
 0x344   : > { %1839 = vst [vmem:[%s3187_s13 + $0xb4] sm:$0xf] %v2282_v17  ;;  %v3397_v38 = vadd.f32 %v2672_v28, %v1517_v35  ;;  %v1613_v13 = vadd.f32 %v2362_v36, %v3184_v31  ;;  %v1677_v42 = vmul.f32 %v3392_v30, %v3392_v30 }
 0x345   : > { %1720 = vadd.xlane.f32.xlu1 %v1719_v37  ;;  %p2789_p7 = por %p2788_p3, %p2787_p5 }
 0x346   : > { %v3405_v46 = vadd.f32 %v2673_v45, %v1613_v13  ;;  %v1722_v50 = vadd.f32 %v1677_v42, %v1676_v40  ;;  %v1678_v33 = vmul.f32 %v3397_v38, %v3397_v38 }
 0x347   : > { %p2790_p9 = pnand %p2789_p7, %p2783_p0 }
 0x348   : > { %1723 = vadd.xlane.f32.xlu0 %v1722_v50  ;;  %v1679_v51 = vmul.f32 %v3405_v46, %v3405_v46 }
 0x34a   : > { %v1725_v53 = vadd.f32 %v1679_v51, %v1678_v33 }
 0x34c   : > { %1726 = vadd.xlane.f32.xlu1 %v1725_v53 }
 0x39a   : > { %v1682_v31 = vpop.xlane.xlu0 %1681 }
 0x39b   : > { %v1728_v55 = vadd.f32 1e-12, %v1682_v31 }
 0x39d   : > { %2610 = vrsqrt.f32 %v1728_v55 }
 0x39e   : > { %v1685_v56 = vpop.xlane.xlu0 %1684 }
 0x39f   : > { %v1729_v57 = vadd.f32 1e-12, %v1685_v56 }
 0x3a1   : > { %2612 = vrsqrt.f32 %v1729_v57 }
 0x3a2   : > { %v1688_v59 = vpop.xlane.xlu1 %1687 }
 0x3a3   : > { %v1730_v63 = vadd.f32 1e-12, %v1688_v59 }
 0x3a5   : > { %2614 = vrsqrt.f32 %v1730_v63 }
 0x3a6   : > { %v1691_v2 = vpop.xlane.xlu1 %1690 }
 0x3a7   : > { %v1731_v4 = vadd.f32 1e-12, %v1691_v2 }
 0x3a9   : > { %2616 = vrsqrt.f32 %v1731_v4 }
 0x3aa   : > { %v2611_v5 = vpop.eup %2610  ;;  %v1694_v6 = vpop.xlane.xlu0 %1693 }
 0x3ab   : > { %v1840_v9 = vmul.f32 %v2611_v5, %v3193_v41  ;;  %v1841_v10 = vmul.f32 %v2611_v5, %v3197_v48  ;;  %v1732_v15 = vadd.f32 1e-12, %v1694_v6 }
 0x3ad   : > { %v2283_v16 = vpack.c.bf16 %v1841_v10, %v1840_v9  ;;  %2618 = vrsqrt.f32 %v1732_v15 }
 0x3ae   : > { %v2613_v21 = vpop.eup %2612  ;;  %v1697_v22 = vpop.xlane.xlu1 %1696 }
 0x3af   : > { %1968 = vst [vmem:[%s3187_s13 + $0x4] sm:$0xff] %v2283_v16  ;;  %v1842_v24 = vmul.f32 %v2613_v21, %v3201_v52  ;;  %v1843_v25 = vmul.f32 %v2613_v21, %v3210_v60  ;;  %v1733_v18 = vadd.f32 1e-12, %v1697_v22 }
 0x3b1   : > { %v2284_v17 = vpack.c.bf16 %v1843_v25, %v1842_v24  ;;  %2620 = vrsqrt.f32 %v1733_v18 }
 0x3b2   : > { %v2615_v35 = vpop.eup %2614  ;;  %v1700_v36 = vpop.xlane.xlu0 %1699 }
 0x3b3   : > { %1969 = vst [vmem:[%s3187_s13 + $0x10] sm:$0xff] %v2284_v17  ;;  %v1844_v41 = vmul.f32 %v2615_v35, %v3221_v8  ;;  %v1845_v48 = vmul.f32 %v2615_v35, %v3225_v23  ;;  %v1734_v37 = vadd.f32 1e-12, %v1700_v36 }
 0x3b5   : > { %v2285_v28 = vpack.c.bf16 %v1845_v48, %v1844_v41  ;;  %2622 = vrsqrt.f32 %v1734_v37 }
 0x3b6   : > { %v2617_v13 = vpop.eup %2616  ;;  %v1703_v40 = vpop.xlane.xlu1 %1702 }
 0x3b7   : > { %1970 = vst [vmem:[%s3187_s13 + $0x1c] sm:$0xff] %v2285_v28  ;;  %v1846_v52 = vmul.f32 %v2617_v13, %v3231_v27  ;;  %v1847_v60 = vmul.f32 %v2617_v13, %v3238_v32  ;;  %v1735_v42 = vadd.f32 1e-12, %v1703_v40 }
 0x3b9   : > { %v2286_v45 = vpack.c.bf16 %v1847_v60, %v1846_v52  ;;  %2624 = vrsqrt.f32 %v1735_v42 }
 0x3ba   : > { %v2619_v50 = vpop.eup %2618  ;;  %v1706_v33 = vpop.xlane.xlu0 %1705 }
 0x3bb   : > { %1971 = vst [vmem:[%s3187_s13 + $0x28] sm:$0xff] %v2286_v45  ;;  %v1848_v8 = vmul.f32 %v2619_v50, %v3247_v43  ;;  %v1849_v23 = vmul.f32 %v2619_v50, %v3252_v49  ;;  %v1736_v51 = vadd.f32 1e-12, %v1706_v33 }
 0x3bd   : > { %v2287_v53 = vpack.c.bf16 %v1849_v23, %v1848_v8  ;;  %2626 = vrsqrt.f32 %v1736_v51 }
 0x3be   : > { %v2621_v31 = vpop.eup %2620  ;;  %v1709_v55 = vpop.xlane.xlu1 %1708 }
 0x3bf   : > { %1972 = vst [vmem:[%s3187_s13 + $0x34] sm:$0xff] %v2287_v53  ;;  %v1850_v27 = vmul.f32 %v2621_v31, %v3261_v62  ;;  %v1851_v32 = vmul.f32 %v2621_v31, %v3266_v3  ;;  %v1737_v56 = vadd.f32 1e-12, %v1709_v55 }
 0x3c1   : > { %v2288_v57 = vpack.c.bf16 %v1851_v32, %v1850_v27  ;;  %2628 = vrsqrt.f32 %v1737_v56 }
 0x3c2   : > { %v2623_v59 = vpop.eup %2622  ;;  %v1712_v63 = vpop.xlane.xlu0 %1711 }
 0x3c3   : > { %1973 = vst [vmem:[%s3187_s13 + $0x40] sm:$0xff] %v2288_v57  ;;  %v1852_v43 = vmul.f32 %v2623_v59, %v3275_v20  ;;  %v1853_v49 = vmul.f32 %v2623_v59, %v3280_v26  ;;  %v1738_v2 = vadd.f32 1e-12, %v1712_v63 }
 0x3c5   : > { %v2289_v4 = vpack.c.bf16 %v1853_v49, %v1852_v43  ;;  %2630 = vrsqrt.f32 %v1738_v2 }
 0x3c6   : > { %v2625_v5 = vpop.eup %2624  ;;  %v1715_v6 = vpop.xlane.xlu1 %1714 }
 0x3c7   : > { %1974 = vst [vmem:[%s3187_s13 + $0x4c] sm:$0xff] %v2289_v4  ;;  %v1854_v62 = vmul.f32 %v2625_v5, %v3289_v12  ;;  %v1855_v3 = vmul.f32 %v2625_v5, %v3294_v44  ;;  %v1739_v9 = vadd.f32 1e-12, %v1715_v6 }
 0x3c9   : > { %v2290_v10 = vpack.c.bf16 %v1855_v3, %v1854_v62  ;;  %2632 = vrsqrt.f32 %v1739_v9 }
 0x3ca   : > { %v2627_v15 = vpop.eup %2626  ;;  %v1718_v16 = vpop.xlane.xlu0 %1717 }
 0x3cb   : > { %1975 = vst [vmem:[%s3187_s13 + $0x58] sm:$0xff] %v2290_v10  ;;  %v1856_v20 = vmul.f32 %v2627_v15, %v3303_v58  ;;  %v1857_v26 = vmul.f32 %v2627_v15, %v3308_v1  ;;  %v1740_v21 = vadd.f32 1e-12, %v1718_v16 }
 0x3cd   : > { %v2291_v22 = vpack.c.bf16 %v1857_v26, %v1856_v20  ;;  %2634 = vrsqrt.f32 %v1740_v21 }
 0x3ce   : > { %v2629_v24 = vpop.eup %2628  ;;  %v1721_v25 = vpop.xlane.xlu1 %1720 }
 0x3cf   : > { %1976 = vst [vmem:[%s3187_s13 + $0x64] sm:$0xff] %v2291_v22  ;;  %v1858_v12 = vmul.f32 %v2629_v24, %v3317_v19  ;;  %v1859_v44 = vmul.f32 %v2629_v24, %v3322_v34  ;;  %v1741_v18 = vadd.f32 1e-12, %v1721_v25 }
 0x3d1   : > { %v2292_v17 = vpack.c.bf16 %v1859_v44, %v1858_v12  ;;  %2636 = vrsqrt.f32 %v1741_v18  ;;  %v1724_v35 = vpop.xlane.xlu0 %1723 }
 0x3d2   : > { %v2631_v36 = vpop.eup %2630  ;;  %v1742_v58 = vadd.f32 1e-12, %v1724_v35 }
 0x3d3   : > { %1977 = vst [vmem:[%s3187_s13 + $0x70] sm:$0xff] %v2292_v17  ;;  %v1860_v1 = vmul.f32 %v2631_v36, %v3331_v39  ;;  %v1861_v41 = vmul.f32 %v2631_v36, %v3336_v47 }
 0x3d4   : > { %2638 = vrsqrt.f32 %v1742_v58 }
 0x3d5   : > { %v2293_v48 = vpack.c.bf16 %v1861_v41, %v1860_v1  ;;  %v1727_v37 = vpop.xlane.xlu1 %1726 }
 0x3d6   : > { %v2633_v19 = vpop.eup %2632  ;;  %v1743_v28 = vadd.f32 1e-12, %v1727_v37 }
 0x3d7   : > { %1978 = vst [vmem:[%s3187_s13 + $0x7c] sm:$0xff] %v2293_v48  ;;  %v1862_v34 = vmul.f32 %v2633_v19, %v3345_v0  ;;  %v1863_v13 = vmul.f32 %v2633_v19, %v3350_v7 }
 0x3d8   : > { %2640 = vrsqrt.f32 %v1743_v28 }
 0x3d9   : > { %v2294_v40 = vpack.c.bf16 %v1863_v13, %v1862_v34 }
 0x3da   : > { %v2635_v52 = vpop.eup %2634 }
 0x3db   : > { %1979 = vst [vmem:[%s3187_s13 + $0x88] sm:$0xff] %v2294_v40  ;;  %v1864_v39 = vmul.f32 %v2635_v52, %v3359_v29  ;;  %v1865_v47 = vmul.f32 %v2635_v52, %v3364_v14 }
 0x3dd   : > { %v2295_v60 = vpack.c.bf16 %v1865_v47, %v1864_v39 }
 0x3de   : > { %v2637_v42 = vpop.eup %2636 }
 0x3df   : > { %1980 = vst [vmem:[%s3187_s13 + $0x94] sm:$0xff] %v2295_v60  ;;  %v1866_v45 = vmul.f32 %v2637_v42, %v3373_v54  ;;  %v1867_v0 = vmul.f32 %v2637_v42, %v3378_v61 }
 0x3e1   : > { %v2639_v7 = vpop.eup %2638  ;;  %v2296_v50 = vpack.c.bf16 %v1867_v0, %v1866_v45 }
 0x3e2   : > { %v1868_v33 = vmul.f32 %v2639_v7, %v3383_v11  ;;  %v1869_v8 = vmul.f32 %v2639_v7, %v3392_v30 }
 0x3e3   : > { %1981 = vst [vmem:[%s3187_s13 + $0xa0] sm:$0xff] %v2296_v50 }
 0x3e4   : > { %v2297_v29 = vpack.c.bf16 %v1869_v8, %v1868_v33 }
 0x3e5   : > { %v2641_v14 = vpop.eup %2640 }
 0x3e6   : > { %1982 = vst [vmem:[%s3187_s13 + $0xac] sm:$0xff] %v2297_v29  ;;  %v1870_v23 = vmul.f32 %v2641_v14, %v3397_v38  ;;  %v1871_v54 = vmul.f32 %v2641_v14, %v3405_v46 }
 0x3e8   : > { %v2298_v61 = vpack.c.bf16 %v1871_v54, %v1870_v23 }
 0x3ea   : > { %1983 = vst [vmem:[%s3187_s13 + $0xb8] sm:$0xff] %v2298_v61 }
 0x3eb   : > { %2793 = shalt.err (!%p2790_p9)
}
 0x3ec   : > { %s2794_s15 = scalar_lea.hbm %s3463_s9, 3072  ;;  %s2798_s27 = scalar_lea.hbm %s3514_s5, 6144 }
 0x3ed   : > { %p2795_p1 = scmp.ne.s32.totalorder %s3463_s9, %s2794_s15  ;;  %p2799_p11 = scmp.lt.s32.totalorder %s3463_s9, %s3514_s5 }
 0x3ee   : > { %p2800_p13 = scmp.lt.s32.totalorder %s2798_s27, %s2794_s15 }
 0x3ef   : > { %p2796_p8 = pnand %p2795_p1, %p3532_p6 }
 0x3f0   : > { %p2801_p2 = por %p2800_p13, %p2799_p11 }
 0x3f1   : > { %p2797_p10 = pneg %p2796_p8 }
 0x3f3   : > { %p2802_p4 = pnand %p2801_p2, %p2797_p10 }
 0x3f5   : > { %2805 = shalt.err (!%p2802_p4)
}
 0x3f6   : > { %s2865_s14 = smov 192   ;;  %s2866_s28 = smov 12  }
 0x3f7   : > { %2379 = dma.vmem_to_hbm [thread:$0]  (%p3532_p6), %s3465_s16, 3072, %s3463_s9, %s1985_s22, %s2865_s14, %s2865_s14, %s2866_s28  }
 0x3f8 PF: > { %s2014_s30 = sand.u32 1, %s2840_s18   ;;  %p3533_p12 = scmp.ne.s32.totalorder %s3520_s25, 0 }
 0x3f9   : > { %p3534_p0 = scmp.ge.s32.totalorder %s2852_s21, 2  ;;  %s2015_s12 = scalar_lea.sflag [#allocation4], %s2014_s30 }
 0x3fb   : > { %p2396_p5 = pnand %p3534_p0, %p3533_p12 }
 0x3fd   : > { %p2397_p3 = pneg %p2396_p5 }
 0x3ff   : > { %2835 = dma.done.wait (%p2397_p3), %s2015_s12, 3072  }
 0x400   : > { %2837 = vsyncadd (%p2397_p3), %s2015_s12, 4294964224  ;;  %p20_p7 = scmp.ge.s32.totalorder %s2977_s6, 4   ;;  %s3535_s18 = smov %s2844_s19 }
 0x401   : > { %s3536_s19 = smov %s2848_s20  ;;  %s3537_s20 = smov %s2987_s10 }
 0x402   : > { %s3538_s21 = smov %s2977_s6  ;;  %22 = sbr.rel (!%p20_p7) target bundleno = 7 (0x7), region = 97 }
 0x407   :  { %2020 = vsyncpa [#allocation3], 1 }
 0x408   :  { %2022 = vsyncpa [#allocation3 + $0x1], 1 }
 0x409   :  { %2023 = vsyncpa [#allocation6], 1 }
 0x40a   :  { %2024 = vsyncpa [#allocation9], 1 }
 0x40b   :  { %2025 = vsyncpa [#allocation4], 1 }
 0x40c   :  { %2027 = vsyncpa [#allocation4 + $0x1], 1 }

</bundles_post_ra>
